<compile_context>
chip_gen: v7x
topology: tpu7x:2x2x1
jax: 0.10.0
libtpu: 0.0.40
codegen_flags: <defaults>
</compile_context>

<pallas_src>
import jax
import jax.numpy as jnp
from jax.experimental import pallas as pl
from jax.experimental.pallas import tpu as pltpu


# --------------------------------------------------------------------------- #
# Kernel
# --------------------------------------------------------------------------- #
def _vf_kernel(t_ref, xp_ref, w1_ref, w1t_ref, b1_ref, w2_ref, b2_ref, o_ref):
    # t_ref:   SMEM (1, 1)              scalar time
    # xp_ref:  VMEM (tile, pack*D)      pack-folded state tile (lane-dense)
    # w1_ref:  VMEM (pack*D, pack*H)    block-diag first-layer weights (x part)
    # w1t_ref: VMEM (1, pack*H)         tiled first-layer time row W1[D]
    # b1_ref:  VMEM (1, pack*H)         tiled first-layer bias
    # w2_ref:  VMEM (pack*H, pack*D)    block-diag second-layer weights
    # b2_ref:  VMEM (1, pack*D)         tiled second-layer bias
    # o_ref:   VMEM (tile, pack*D)      pack-folded output tile (lane-dense)
    t = t_ref[0, 0]
    x = xp_ref[...].astype(w1_ref.dtype)  # bf16 (or f32) MXU operand

    # Hidden layer:  x @ W1[:D]  +  (t * W1[D] + b1)     (fused concat + bias)
    h = jnp.dot(x, w1_ref[...], preferred_element_type=jnp.float32)
    tb = t * w1t_ref[...] + b1_ref[...]        # single (1, pack*H) row, f32
    h = h + tb                                 # ONE broadcast add over the tile
    h = h * jax.nn.sigmoid(h)                  # SiLU in f32 (VPU + EUP)

    # Output layer
    o = jnp.dot(h.astype(w2_ref.dtype), w2_ref[...],
                preferred_element_type=jnp.float32)
    o = o + b2_ref[...]
    o_ref[...] = o.astype(o_ref.dtype)


# --------------------------------------------------------------------------- #
# Parameter packing (call once per solve, reuse across solver steps)
# --------------------------------------------------------------------------- #
def prepare_params(params, d_in, batch_size, *, compute_dtype=jnp.bfloat16):
    """Fold `pack` samples per row via block-diagonal weights (lane density)."""
    W1, b1, W2, b2 = params          # W1: [D+1, H], b1: [H], W2: [H, D], b2: [D]
    D = d_in
    H = W1.shape[1]

    pack = 128 // D if (D < 128 and 128 % D == 0) else 1
    if batch_size % pack != 0:
        pack = 1

    eye = jnp.eye(pack, dtype=jnp.float32)
    w1x = jnp.kron(eye, W1[:D, :].astype(jnp.float32)).astype(compute_dtype)
    w2b = jnp.kron(eye, W2.astype(jnp.float32)).astype(compute_dtype)
    w1t = jnp.tile(W1[D:D + 1, :].astype(jnp.float32), (1, pack))   # (1, pack*H)
    b1t = jnp.tile(b1.reshape(1, H).astype(jnp.float32), (1, pack))
    b2t = jnp.tile(b2.reshape(1, D).astype(jnp.float32), (1, pack))
    return dict(pack=pack, D=D, H=H, w1x=w1x, w1t=w1t, b1=b1t, w2=w2b, b2=b2t)


def _choose_tile_rows(bp, target):
    """Largest row-tile <= target that divides bp (multiple of 8 when tiled)."""
    if bp <= target:
        return bp                              # single tile == full array: OK
    c = (target // 8) * 8
    while c >= 8:
        if bp % c == 0:
            return c
        c -= 8
    return bp                                  # fallback: one big tile


# --------------------------------------------------------------------------- #
# Forward
# --------------------------------------------------------------------------- #
def torchdyn_wrapper_forward(t, x, packed, *, tile_samples=1024):
    """Pallas equivalent of torchdyn_wrapper(model).forward(t, x)."""
    pack, D, H = packed["pack"], packed["D"], packed["H"]
    B, Dx = x.shape
    assert Dx == D and B % pack == 0

    Bp, Dp, Hp = B // pack, pack * D, pack * H

    # Free row-major views at the HBM level (no data movement, lane-dense).
    xp = x.reshape(Bp, Dp)
    t_arr = jnp.reshape(t, (1, 1)).astype(jnp.float32)

    tile_rows = _choose_tile_rows(Bp, max(1, tile_samples // pack))
    grid = (Bp // tile_rows,)

    weight_bytes = sum(int(packed[k].size) * packed[k].dtype.itemsize
                       for k in ("w1x", "w1t", "b1", "w2", "b2"))
    cost = pl.CostEstimate(
        flops=4 * B * D * H,                        # two matmuls, 2*B*D*H each
        transcendentals=B * H,                      # sigmoid in SiLU
        bytes_accessed=2 * int(x.size) * x.dtype.itemsize + weight_bytes,
    )

    out_p = pl.pallas_call(
        _vf_kernel,
        out_shape=jax.ShapeDtypeStruct((Bp, Dp), x.dtype),
        grid_spec=pltpu.PrefetchScalarGridSpec(
            num_scalar_prefetch=0,
            grid=grid,
            in_specs=[
                pl.BlockSpec((1, 1), lambda i: (0, 0),
                             memory_space=pltpu.MemorySpace.SMEM),   # t
                pl.BlockSpec((tile_rows, Dp), lambda i: (i, 0)),     # x tile
                pl.BlockSpec((Dp, Hp), lambda i: (0, 0)),            # W1 block
                pl.BlockSpec((1, Hp), lambda i: (0, 0)),             # W1[D] row
                pl.BlockSpec((1, Hp), lambda i: (0, 0)),             # b1
                pl.BlockSpec((Hp, Dp), lambda i: (0, 0)),            # W2 block
                pl.BlockSpec((1, Dp), lambda i: (0, 0)),             # b2
            ],
            out_specs=pl.BlockSpec((tile_rows, Dp), lambda i: (i, 0)),
        ),
        compiler_params=pltpu.CompilerParams(
            dimension_semantics=("parallel",),       # shard batch across TCs
        ),
        cost_estimate=cost,
    )(t_arr, xp, packed["w1x"], packed["w1t"], packed["b1"],
      packed["w2"], packed["b2"])

    return out_p.reshape(B, D)


# --------------------------------------------------------------------------- #
# Plain-JAX reference (exact PyTorch semantics) and self-test
# --------------------------------------------------------------------------- #
def _reference_forward(t, x, params):
    W1, b1, W2, b2 = params
    B = x.shape[0]
    t_col = jnp.broadcast_to(jnp.reshape(t, (1, 1)), (B, 1))   # t.repeat(B)[:,None]
    xin = jnp.concatenate([x, t_col], axis=1)                  # [B, D+1]
    h = jnp.dot(xin, W1, precision=jax.lax.Precision.HIGHEST) + b1
    h = h * jax.nn.sigmoid(h)
    return jnp.dot(h, W2, precision=jax.lax.Precision.HIGHEST) + b2


if __name__ == "__main__":
    B, D, H = 2048, 32, 64                       # small MLP vector field

    key = jax.random.PRNGKey(0)
    k_x, k_w1, k_b1, k_w2, k_b2 = jax.random.split(key, 5)

    x = jax.random.normal(k_x, (B, D), dtype=jnp.float32)
    t = jnp.float32(0.37)

    W1 = jax.random.normal(k_w1, (D + 1, H), dtype=jnp.float32) * 0.1
    b1 = jax.random.normal(k_b1, (H,), dtype=jnp.float32) * 0.1
    W2 = jax.random.normal(k_w2, (H, D), dtype=jnp.float32) * 0.1
    b2 = jax.random.normal(k_b2, (D,), dtype=jnp.float32) * 0.1
    params = (W1, b1, W2, b2)

    ref = _reference_forward(t, x, params)

    # bf16 MXU-operand path (recommended default).
    packed_bf16 = prepare_params(params, D, B, compute_dtype=jnp.bfloat16)
    out_bf16 = jax.block_until_ready(torchdyn_wrapper_forward(t, x, packed_bf16))
    assert out_bf16.shape == (B, D)
    assert jnp.allclose(out_bf16, ref, atol=5e-2, rtol=5e-2), "bf16 mismatch"

    # f32 path (tight numerical check of the fused/packed formulation).
    packed_f32 = prepare_params(params, D, B, compute_dtype=jnp.float32)
    out_f32 = jax.block_until_ready(torchdyn_wrapper_forward(t, x, packed_f32))
    assert out_f32.shape == (B, D)
    assert jnp.allclose(out_f32, ref, atol=1e-4, rtol=1e-4), "f32 mismatch"

    print("KERNEL_OK")
</pallas_src>

<mosaic_0001>
module attributes {stable_mosaic.version = 11 : i64} {
  func.func @_vf_kernel(%arg0: i32, %arg1: memref<1x1xf32, #tpu.memory_space<smem>>, %arg2: memref<256x128xf32, #tpu.memory_space<vmem>>, %arg3: memref<128x256xbf16, #tpu.memory_space<vmem>>, %arg4: memref<1x256xf32, #tpu.memory_space<vmem>>, %arg5: memref<1x256xf32, #tpu.memory_space<vmem>>, %arg6: memref<256x128xbf16, #tpu.memory_space<vmem>>, %arg7: memref<1x128xf32, #tpu.memory_space<vmem>>, %arg8: memref<256x128xf32, #tpu.memory_space<vmem>>) attributes {dimension_semantics = [#tpu.dimension_semantics<parallel>], iteration_bounds = array<i64: 2>, scalar_prefetch = 0 : i64, scratch_operands = 0 : i64, tpu.core_type = #tpu.core_type<tc>, window_params = [{transform_indices = @transform_0, window_bounds = array<i64: 1, 1>}, {transform_indices = @transform_1, window_bounds = array<i64: 256, 128>}, {pipeline_mode = #tpu.pipeline_mode<synchronous>, transform_indices = @transform_2, window_bounds = array<i64: 128, 256>}, {pipeline_mode = #tpu.pipeline_mode<synchronous>, transform_indices = @transform_3, window_bounds = array<i64: 1, 256>}, {pipeline_mode = #tpu.pipeline_mode<synchronous>, transform_indices = @transform_4, window_bounds = array<i64: 1, 256>}, {pipeline_mode = #tpu.pipeline_mode<synchronous>, transform_indices = @transform_5, window_bounds = array<i64: 256, 128>}, {pipeline_mode = #tpu.pipeline_mode<synchronous>, transform_indices = @transform_6, window_bounds = array<i64: 1, 128>}, {transform_indices = @transform_7, window_bounds = array<i64: 256, 128>}]} {
    %c0 = arith.constant 0 : index
    %c0_0 = arith.constant 0 : index
    %0 = memref.load %arg1[%c0, %c0_0] : memref<1x1xf32, #tpu.memory_space<smem>>
    %c0_1 = arith.constant 0 : index
    %c0_2 = arith.constant 0 : index
    %1 = vector.load %arg2[%c0_1, %c0_2] : memref<256x128xf32, #tpu.memory_space<vmem>>, vector<256x128xf32>
    %2 = arith.truncf %1 : vector<256x128xf32> to vector<256x128xbf16>
    %c0_3 = arith.constant 0 : index
    %c0_4 = arith.constant 0 : index
    %3 = vector.load %arg3[%c0_3, %c0_4] : memref<128x256xbf16, #tpu.memory_space<vmem>>, vector<128x256xbf16>
    %cst = arith.constant dense<0.000000e+00> : vector<256x256xf32>
    %4 = tpu.matmul %2, %3, %cst {dimension_numbers = #tpu.dot_dimension_numbers<[1], [0], [0], [1], [0, 0, 1, 1], [], []>} : vector<256x128xbf16>, vector<128x256xbf16>, vector<256x256xf32> -> vector<256x256xf32>
    %c0_5 = arith.constant 0 : index
    %c0_6 = arith.constant 0 : index
    %5 = vector.load %arg4[%c0_5, %c0_6] : memref<1x256xf32, #tpu.memory_space<vmem>>, vector<1x256xf32>
    %6 = vector.broadcast %0 : f32 to vector<1x256xf32>
    %7 = arith.mulf %6, %5 : vector<1x256xf32>
    %c0_7 = arith.constant 0 : index
    %c0_8 = arith.constant 0 : index
    %8 = vector.load %arg5[%c0_7, %c0_8] : memref<1x256xf32, #tpu.memory_space<vmem>>, vector<1x256xf32>
    %9 = arith.addf %7, %8 : vector<1x256xf32>
    %10 = vector.broadcast %9 : vector<1x256xf32> to vector<256x256xf32>
    %11 = arith.addf %4, %10 : vector<256x256xf32>
    %12 = arith.negf %11 : vector<256x256xf32>
    %13 = math.exp %12 : vector<256x256xf32>
    %cst_9 = arith.constant 1.000000e+00 : f32
    %14 = vector.broadcast %cst_9 : f32 to vector<256x256xf32>
    %15 = arith.addf %14, %13 : vector<256x256xf32>
    %16 = arith.divf %14, %15 : vector<256x256xf32>
    %17 = arith.mulf %11, %16 : vector<256x256xf32>
    %18 = arith.truncf %17 : vector<256x256xf32> to vector<256x256xbf16>
    %c0_10 = arith.constant 0 : index
    %c0_11 = arith.constant 0 : index
    %19 = vector.load %arg6[%c0_10, %c0_11] : memref<256x128xbf16, #tpu.memory_space<vmem>>, vector<256x128xbf16>
    %cst_12 = arith.constant dense<0.000000e+00> : vector<256x128xf32>
    %20 = tpu.matmul %18, %19, %cst_12 {dimension_numbers = #tpu.dot_dimension_numbers<[1], [0], [0], [1], [0, 0, 1, 1], [], []>} : vector<256x256xbf16>, vector<256x128xbf16>, vector<256x128xf32> -> vector<256x128xf32>
    %c0_13 = arith.constant 0 : index
    %c0_14 = arith.constant 0 : index
    %21 = vector.load %arg7[%c0_13, %c0_14] : memref<1x128xf32, #tpu.memory_space<vmem>>, vector<1x128xf32>
    %22 = vector.broadcast %21 : vector<1x128xf32> to vector<256x128xf32>
    %23 = arith.addf %20, %22 : vector<256x128xf32>
    %c0_15 = arith.constant 0 : index
    %c0_16 = arith.constant 0 : index
    %24 = vector.load %arg8[%c0_15, %c0_16] : memref<256x128xf32, #tpu.memory_space<vmem>>, vector<256x128xf32>
    tpu.vector_store %arg8[%c0_15, %c0_16], %23 {strides = array<i32>} : memref<256x128xf32, #tpu.memory_space<vmem>>, vector<256x128xf32>,
    return
  }
  func.func @transform_0(%arg0: i32) -> (i32, i32) {
    %c0_i32 = arith.constant 0 : i32
    %c0_i32_0 = arith.constant 0 : i32
    %c0_i32_1 = arith.constant 0 : i32
    return %c0_i32, %c0_i32_0 : i32, i32
  }
  func.func @transform_1(%arg0: i32) -> (i32, i32) {
    %c0_i32 = arith.constant 0 : i32
    %c0_i32_0 = arith.constant 0 : i32
    return %arg0, %c0_i32 : i32, i32
  }
  func.func @transform_2(%arg0: i32) -> (i32, i32) {
    %c0_i32 = arith.constant 0 : i32
    %c0_i32_0 = arith.constant 0 : i32
    %c0_i32_1 = arith.constant 0 : i32
    return %c0_i32, %c0_i32_0 : i32, i32
  }
  func.func @transform_3(%arg0: i32) -> (i32, i32) {
    %c0_i32 = arith.constant 0 : i32
    %c0_i32_0 = arith.constant 0 : i32
    %c0_i32_1 = arith.constant 0 : i32
    return %c0_i32, %c0_i32_0 : i32, i32
  }
  func.func @transform_4(%arg0: i32) -> (i32, i32) {
    %c0_i32 = arith.constant 0 : i32
    %c0_i32_0 = arith.constant 0 : i32
    %c0_i32_1 = arith.constant 0 : i32
    return %c0_i32, %c0_i32_0 : i32, i32
  }
  func.func @transform_5(%arg0: i32) -> (i32, i32) {
    %c0_i32 = arith.constant 0 : i32
    %c0_i32_0 = arith.constant 0 : i32
    %c0_i32_1 = arith.constant 0 : i32
    return %c0_i32, %c0_i32_0 : i32, i32
  }
  func.func @transform_6(%arg0: i32) -> (i32, i32) {
    %c0_i32 = arith.constant 0 : i32
    %c0_i32_0 = arith.constant 0 : i32
    %c0_i32_1 = arith.constant 0 : i32
    return %c0_i32, %c0_i32_0 : i32, i32
  }
  func.func @transform_7(%arg0: i32) -> (i32, i32) {
    %c0_i32 = arith.constant 0 : i32
    %c0_i32_0 = arith.constant 0 : i32
    return %arg0, %c0_i32 : i32, i32
  }
}

</mosaic_0001>

<bundles_post_ra>
// kernel: tpu_custom_call.1
= control target key start
LH: loop header
LB: loop body
LE: loop exit
PB: predicated region body
PF: predicated region fallthrough
CT: control target
= control target key end

     0   :  { %s3105_s0 = inlined_call_operand.<no memory space> [shape: f32[1,1], index: 0, kind: input, shape index: {}]   ;;  %s3106_s1 = inlined_call_operand.hbm [shape: f32[512,128], index: 1, kind: input, shape index: {}]   ;;  %s3107_s2 = inlined_call_operand.hbm [shape: bf16[128,256], index: 2, kind: input, shape index: {}]   ;;  %s3108_s3 = inlined_call_operand.vmem [shape: f32[1,256], index: 3, kind: input, shape index: {}]   ;;  %s3109_s4 = inlined_call_operand.vmem [shape: f32[1,256], index: 4, kind: input, shape index: {}]   ;;  %s3110_s5 = inlined_call_operand.hbm [shape: bf16[256,128], index: 5, kind: input, shape index: {}]   ;;  %s3111_s6 = inlined_call_operand.vmem [shape: f32[1,128], index: 6, kind: input, shape index: {}]   ;;  %s3112_s7 = inlined_call_operand.hbm [shape: f32[512,128], index: 7, kind: output, shape index: {}]  }
   0x1   :  { %12 = sst [smem:[#allocation2]] %s3105_s0 }
   0x2   :  { %13 = vsyncpa [#allocation4], 0 }
   0x3   :  { %15 = vsyncpa [#allocation4 + $0x1], 0 }
   0x4   :  { %16 = vsyncpa [#allocation7], 0 }
   0x5   :  { %17 = vsyncpa [#allocation5], 0 }
   0x6   :  { %19 = vsyncpa [#allocation5 + $0x1], 0  ;;  %s2409_s26 = smov 0   ;;  %s2411_s27 = smov 0  }
   0x7   :  { %s2413_s28 = smov 0   ;;  %s2415_s29 = smov 0  }
   0x8 LB: > { %s2430_s0 = sadd.s32 4294967295, %s2353_s29   ;;  %s1598_s30 = sadd.s32 4294967294, %s2353_s29   ;;  %s2353_s29 = sphi %s2415_s29, %s3132_s29   ;;  %s2349_s28 = sphi %s2413_s28, %s3131_s28   ;;  %s2345_s27 = sphi %s2411_s27, %s3130_s27   ;;  %s2341_s26 = sphi %s2409_s26, %s3129_s26  }
   0x9   : > { %p66_p0 = scmp.ne.s32.totalorder %s2345_s27, %s2341_s26  ;;  %p3113_p1 = scmp.eq.s32.totalorder %s2430_s0, 0 }
   0xa   : > { %p201_p3 = scmp.eq.s32.totalorder %s1598_s30, 1  ;;  %p1599_p5 = scmp.ge.s32.totalorder %s2353_s29, 1 }
   0xb   : > { %p2439_p4 = por %p3113_p1, %p66_p0  ;;  %p208_p7 = scmp.lt.s32.totalorder %s2353_s29, 3 }
   0xc   : > { %p2444_p6 = por %p201_p3, %p66_p0  ;;  %s2355_s11 = smov [#allocation6]  }
   0xd   : > { %s3116_s8 = scalar_select %p2439_p4, 1, 0 }
   0xe   : > { %s3117_s9 = scalar_select %p2444_p6, 1, 0 }
   0xf   : > { %p2449_p8 = pnand %p1599_p5, %p208_p7  ;;  %s223_s12 = sshll.u32 %s2355_s11, 4  ;;  %s2453_s12 = int_to_ptr.vmem [resolvable:$true] %s223_s12 }
  0x10   : > { %s2356_s14 = smov [#allocation8]   ;;  %s2197_s18 = scalar_lea.hbm %s3107_s2, 2048 }
  0x11   : > { %p1839_p9 = pneg %p2449_p8  ;;  %s242_s15 = sshll.u32 %s2356_s14, 4  ;;  %s2464_s15 = int_to_ptr.vmem [resolvable:$true] %s242_s15 }
  0x12   : > { %p2198_p12 = scmp.ne.s32.totalorder %s3107_s2, %s2197_s18  ;;  %p2204_p5 = scmp.lt.u32.totalorder %s2197_s18, %s3107_s2 }
  0x13   : > { %p2460_p11 = pnand %p1839_p9, %p3113_p1 }
  0x15   : > { %p2199_p13 = pneg %p2460_p11 }
  0x17   : > { %p2200_p0 = pnand %p2199_p13, %p2198_p12 }
  0x19   : > { %p2201_p3 = pneg %p2200_p0 }
  0x1b   : > { %p2206_p7 = pnand %p2204_p5, %p2201_p3 }
  0x1d   : > { %2209 = shalt.err (!%p2206_p7)
}
  0x1e   : > { %s2210_s23 = scalar_lea.vmem %s2453_s12, 2048  ;;  %p2218_p2 = scmp.lt.s32.totalorder %s2453_s12, %s2453_s12 }
  0x1f   : > { %p2211_p9 = scmp.ne.s32.totalorder %s2453_s12, %s2210_s23  ;;  %p2219_p12 = scmp.lt.s32.totalorder %s2210_s23, %s2210_s23 }
  0x21   : > { %p2213_p10 = pnand %p2211_p9, %p2199_p13  ;;  %p2220_p0 = por %p2219_p12, %p2218_p2 }
  0x23   : > { %p2214_p1 = pneg %p2213_p10 }
  0x25   : > { %p2221_p6 = pnand %p2220_p0, %p2214_p1 }
  0x27   : > { %2224 = shalt.err (!%p2221_p6)
}
  0x28   : > { %s2357_s24 = smov 128   ;;  %s2358_s25 = smov 8  }
  0x29   : > { %1842 = dma.hbm_to_vmem [thread:$0]  (!%p2460_p11), %s3107_s2, 2048, %s2453_s12, [#allocation7], %s2357_s24, %s2357_s24, %s2358_s25  }
  0x2a   : > { %s2225_s17 = scalar_lea.hbm %s3110_s5, 2048 }
  0x2b   : > { %p2226_p1 = scmp.ne.s32.totalorder %s3110_s5, %s2225_s17  ;;  %p2232_p10 = scmp.lt.u32.totalorder %s2225_s17, %s3110_s5 }
  0x2d   : > { %p2228_p2 = pnand %p2226_p1, %p2199_p13 }
  0x2f   : > { %p2229_p6 = pneg %p2228_p2 }
  0x31   : > { %p2234_p3 = pnand %p2232_p10, %p2229_p6 }
  0x33   : > { %2237 = shalt.err (!%p2234_p3)
}
  0x34   : > { %s2238_s12 = scalar_lea.vmem %s2464_s15, 2048  ;;  %p2246_p12 = scmp.lt.s32.totalorder %s2464_s15, %s2464_s15 }
  0x35   : > { %p2239_p5 = scmp.ne.s32.totalorder %s2464_s15, %s2238_s12  ;;  %p2247_p0 = scmp.lt.s32.totalorder %s2238_s12, %s2238_s12 }
  0x37   : > { %p2241_p7 = pnand %p2239_p5, %p2199_p13  ;;  %p2248_p1 = por %p2247_p0, %p2246_p12 }
  0x39   : > { %p2242_p9 = pneg %p2241_p7 }
  0x3b   : > { %p2249_p2 = pnand %p2248_p1, %p2242_p9 }
  0x3d   : > { %2252 = shalt.err (!%p2249_p2)
}
  0x3e   : > { %s2359_s22 = smov 64   ;;  %s2360_s23 = smov 4  }
  0x3f   : > { %1845 = dma.hbm_to_vmem [thread:$0]  (!%p2460_p11), %s3110_s5, 2048, %s2464_s15, [#allocation7], %s2359_s22, %s2359_s22, %s2360_s23  }
  0x40   : > { %s2522_s14 = sadd.s32 1, %s2353_s29   ;;  %s53_s17 = sadd.s32 1, %s2349_s28 }
  0x41   : > { %s50_s16 = ssub.s32 %s2353_s29, %s2522_s14  ;;  %p60_p6 = scmp.ne.s32.totalorder %s2349_s28, %s2345_s27 }
  0x42   : > { %p51_p13 = scmp.eq.s32.totalorder %s50_s16, 0  ;;  %p61_p10 = scmp.eq.s32.totalorder %s2353_s29, 0 }
  0x43   : > { %p3120_p5 = scmp.eq.s32.totalorder %s2430_s0, 1  ;;  %p1856_p9 = scmp.lt.s32.totalorder %s2353_s29, 2 }
  0x44   : > { %s2531_s18 = scalar_select %p51_p13, %s2349_s28, %s53_s17  }
  0x45   : > { %p62_p3 = por %p61_p10, %p60_p6  ;;  %p2535_p7 = por %p3120_p5, %p60_p6 }
  0x46   : > { %s259_s13 = sand.u32 1, %s2349_s28   ;;  %s1713_s15 = sshll.u32 %s2353_s29, 12 }
  0x47   : > { %s3121_s19 = scalar_select %p2535_p7, 1, 0 }
  0x48   : > { %s1603_s20 = sshll.u32 %s259_s13, 8  ;;  %s2545_s22 = scalar_lea.hbm %s3106_s1, %s1713_s15 }
  0x49   : > { %s263_s23 = scalar_lea.vmem [#allocation3], %s1603_s20  ;;  %p2549_p11 = pnand %p1856_p9, %p62_p3 }
  0x4a   : > { %s270_s30 = sshll.u32 %s263_s23, 4  ;;  %s2553_s16 = scalar_lea.sflag [#allocation4], %s259_s13  ;;  %s2547_s30 = int_to_ptr.vmem [resolvable:$true] %s270_s30 }
  0x4b   : > { %s2253_s17 = scalar_lea.hbm %s2545_s22, 4096  ;;  %p2255_p0 = pneg %p2549_p11 }
  0x4c   : > { %p2254_p12 = scmp.ne.s32.totalorder %s2545_s22, %s2253_s17  ;;  %s2258_s21 = scalar_lea.hbm %s3106_s1, 8192 }
  0x4d   : > { %p2259_p13 = scmp.lt.u32.totalorder %s2545_s22, %s3106_s1  ;;  %p2260_p6 = scmp.lt.u32.totalorder %s2258_s21, %s2253_s17 }
  0x4e   : > { %p2256_p1 = pnand %p2255_p0, %p2254_p12  ;;  %p2262_p3 = scmp.lt.u32.totalorder %s2253_s17, %s2545_s22 }
  0x4f   : > { %p2261_p10 = por %p2260_p6, %p2259_p13 }
  0x50   : > { %p2257_p2 = pneg %p2256_p1 }
  0x51   : > { %p2263_p5 = por %p2262_p3, %p2261_p10 }
  0x53   : > { %p2264_p9 = pnand %p2263_p5, %p2257_p2 }
  0x55   : > { %2267 = shalt.err (!%p2264_p9)
}
  0x56   : > { %s2268_s13 = scalar_lea.vmem %s2547_s30, 4096  ;;  %s2361_s20 = smov [#allocation3]  }
  0x57   : > { %p2269_p12 = scmp.ne.s32.totalorder %s2547_s30, %s2268_s13  ;;  %s2273_s15 = sshll.u32 %s2361_s20, 4  ;;  %s2274_s15 = int_to_ptr.vmem [resolvable:$false] %s2273_s15 }
  0x58   : > { %s2275_s12 = scalar_lea.vmem %s2274_s15, 8192  ;;  %p2276_p4 = scmp.lt.s32.totalorder %s2547_s30, %s2274_s15 }
  0x59   : > { %p2271_p1 = pnand %p2269_p12, %p2255_p0  ;;  %p2277_p13 = scmp.lt.s32.totalorder %s2275_s12, %s2268_s13 }
  0x5b   : > { %p2272_p7 = pneg %p2271_p1  ;;  %p2278_p6 = por %p2277_p13, %p2276_p4 }
  0x5d   : > { %p2279_p10 = pnand %p2278_p6, %p2272_p7 }
  0x5f   : > { %2282 = shalt.err (!%p2279_p10)
}
  0x60   : > { %1849 = dma.hbm_to_vmem [thread:$0]  (!%p2549_p11), %s2545_s22, 4096, %s2547_s30, %s2553_s16, %s2357_s24, %s2357_s24, %s2358_s25  }
  0x61   : > { %282 = sbr.rel (%p2449_p8) target bundleno = 749 (0x2ed), region = 48  ;;  %s2587_s17 = sand.u32 (!%p2449_p8), 1, %s2345_s27  }
  0x62   : > { %s1607_s21 = sshll.u32 (!%p2449_p8), %s2587_s17, 8  ;;  %s285_s23 = scalar_lea.sflag (!%p2449_p8), [#allocation4], %s2587_s17 }
  0x63   : > { %s2593_s11 = scalar_lea.vmem (!%p2449_p8), [#allocation3], %s1607_s21  ;;  %p3123_p4 = scmp.ne.s32.totalorder (!%p2449_p8), %s3116_s8, 0 }
  0x68   : > { %2328 = dma.done.wait (%p3123_p4), %s285_s23, 4096  }
  0x69   : > { %2330 = vsyncadd (%p3123_p4), %s285_s23, 4294963200  ;;  %p3124_p7 = scmp.eq.s32.totalorder %s2430_s0, 0 }
  0x6b   : > { %2332 = dma.done.wait (%p3124_p7), [#allocation7], 4096   ;;  %p3125_p8 = pmov %p3124_p7 }
  0x6c   : > { %v2362_v0 = vmov 0   ;;  %v1901_v1 = vld [vmem:[#allocation6 + $0x4] ss:$8 sps:$4 sm:$0xff]   ;;  %v1903_v2 = vld [vmem:[#allocation6] ss:$8 sps:$4 sm:$0xff]   ;;  %v333_v20 = vld [vmem:[%s2593_s11 + $0x10] sm:$0xff] }
  0x6d   : > { %2334 = vsyncadd (%p3125_p8), [#allocation7], 4294963200  ;;  %523 = vmatprep.mubr.bf16.mxu0 %v2362_v0  ;;  %491 = vmatprep.subr.bf16.mxu0 %v1901_v1  ;;  %v1904_v3 = vld [vmem:[#allocation6 + $0x14] ss:$8 sps:$4 sm:$0xff]   ;;  %v1906_v4 = vld [vmem:[#allocation6 + $0x10] ss:$8 sps:$4 sm:$0xff]  }
  0x6e   : > { %492 = vmatpush1.bf16.msra.mxu0 %v1903_v2  ;;  %v1907_v5 = vld [vmem:[#allocation6 + $0x24] ss:$8 sps:$4 sm:$0xff]   ;;  %v1909_v6 = vld [vmem:[#allocation6 + $0x20] ss:$8 sps:$4 sm:$0xff]   ;;  %v1910_v7 = vld [vmem:[#allocation6 + $0x34] ss:$8 sps:$4 sm:$0xff]  }
  0x6f   : > { %493 = vmatprep.subr.bf16.mxu0 %v1904_v3  ;;  %v1912_v8 = vld [vmem:[#allocation6 + $0x30] ss:$8 sps:$4 sm:$0xff]   ;;  %v1913_v9 = vld [vmem:[#allocation6 + $0x44] ss:$8 sps:$4 sm:$0xff]   ;;  %v1915_v10 = vld [vmem:[#allocation6 + $0x40] ss:$8 sps:$4 sm:$0xff]  }
  0x70   : > { %v1916_v11 = vld [vmem:[#allocation6 + $0x54] ss:$8 sps:$4 sm:$0xff]   ;;  %v1918_v12 = vld [vmem:[#allocation6 + $0x50] ss:$8 sps:$4 sm:$0xff]   ;;  %v1919_v13 = vld [vmem:[#allocation6 + $0x64] ss:$8 sps:$4 sm:$0xff]  }
  0x71   : > { %v1921_v14 = vld [vmem:[#allocation6 + $0x60] ss:$8 sps:$4 sm:$0xff]   ;;  %v1922_v15 = vld [vmem:[#allocation6 + $0x74] ss:$8 sps:$4 sm:$0xff]   ;;  %v1924_v16 = vld [vmem:[#allocation6 + $0x70] ss:$8 sps:$4 sm:$0xff]  }
  0x72   : > { %494 = vmatpush1.bf16.msra.mxu0 %v1906_v4  ;;  %v331_v17 = vld [vmem:[%s2593_s11] sm:$0xff]  ;;  %v332_v18 = vld [vmem:[%s2593_s11 + $0x8] sm:$0xff]  ;;  %v334_v21 = vld [vmem:[%s2593_s11 + $0x18] sm:$0xff]  ;;  %s330_s8 = sld [smem:[#allocation2]]  ;;  %s2989_s13 = scalar_lea.vmem [#allocation9], %s1607_s21 }
  0x73   : > { %495 = vmatprep.subr.bf16.mxu0 %v1907_v5  ;;  %v363_v19 = vpack.c.bf16 %v332_v18, %v331_v17  ;;  %v364_v22 = vpack.c.bf16 %v334_v21, %v333_v20  ;;  %v335_v23 = vld [vmem:[%s2593_s11 + $0x20] sm:$0xff]  ;;  %v336_v24 = vld [vmem:[%s2593_s11 + $0x28] sm:$0xff]  ;;  %v337_v26 = vld [vmem:[%s2593_s11 + $0x30] sm:$0xff]  ;;  %v401_v18 = vlaneseq  ;;  %s1714_s20 = sshll.u32 %s2430_s0, 12  ;;  %s1506_s15 = sshll.u32 %s2989_s13, 4  ;;  %s3058_s15 = int_to_ptr.vmem [resolvable:$true] %s1506_s15 }
  0x74   : > { %v365_v25 = vpack.c.bf16 %v336_v24, %v335_v23  ;;  %v338_v27 = vld [vmem:[%s2593_s11 + $0x38] sm:$0xff]  ;;  %v339_v29 = vld [vmem:[%s2593_s11 + $0x40] sm:$0xff]  ;;  %v340_v30 = vld [vmem:[%s2593_s11 + $0x48] sm:$0xff]  ;;  %s3056_s23 = scalar_lea.hbm %s3112_s7, %s1714_s20  ;;  %s1493_s0 = scalar_lea.sflag [#allocation5], %s2587_s17 }
  0x75   : > { %v366_v28 = vpack.c.bf16 %v338_v27, %v337_v26  ;;  %v367_v31 = vpack.c.bf16 %v340_v30, %v339_v29  ;;  %v341_v32 = vld [vmem:[%s2593_s11 + $0x50] sm:$0xff]  ;;  %v342_v33 = vld [vmem:[%s2593_s11 + $0x58] sm:$0xff]  ;;  %v343_v35 = vld [vmem:[%s2593_s11 + $0x60] sm:$0xff]  ;;  %p3126_p0 = scmp.ne.s32.totalorder %s3121_s19, 0 }
  0x76   : > { %496 = vmatpush1.bf16.msra.mxu0 %v1909_v6  ;;  %v368_v34 = vpack.c.bf16 %v342_v33, %v341_v32  ;;  %v344_v36 = vld [vmem:[%s2593_s11 + $0x68] sm:$0xff]  ;;  %v345_v38 = vld [vmem:[%s2593_s11 + $0x70] sm:$0xff]  ;;  %v346_v39 = vld [vmem:[%s2593_s11 + $0x78] sm:$0xff] }
  0x77   : > { %497 = vmatprep.subr.bf16.mxu0 %v1910_v7  ;;  %v369_v37 = vpack.c.bf16 %v344_v36, %v343_v35  ;;  %v370_v40 = vpack.c.bf16 %v346_v39, %v345_v38  ;;  %v347_v41 = vld [vmem:[%s2593_s11 + $0x80] sm:$0xff]  ;;  %v348_v42 = vld [vmem:[%s2593_s11 + $0x88] sm:$0xff]  ;;  %v349_v44 = vld [vmem:[%s2593_s11 + $0x90] sm:$0xff] }
  0x78   : > { %v371_v43 = vpack.c.bf16 %v348_v42, %v347_v41  ;;  %v350_v45 = vld [vmem:[%s2593_s11 + $0x98] sm:$0xff]  ;;  %v351_v47 = vld [vmem:[%s2593_s11 + $0xa0] sm:$0xff]  ;;  %v352_v48 = vld [vmem:[%s2593_s11 + $0xa8] sm:$0xff]  ;;  %v396_v20 = vstv %s330_s8  ;;  %s2363_s8 = smov [#allocation9]  }
  0x79   : > { %v372_v46 = vpack.c.bf16 %v350_v45, %v349_v44  ;;  %v373_v49 = vpack.c.bf16 %v352_v48, %v351_v47  ;;  %v353_v50 = vld [vmem:[%s2593_s11 + $0xb0] sm:$0xff]  ;;  %v354_v51 = vld [vmem:[%s2593_s11 + $0xb8] sm:$0xff]  ;;  %v1925_v53 = vld [vmem:[#allocation8 + $0x40] sm:$0xff]   ;;  %s2287_s10 = sshll.u32 %s2363_s8, 4  ;;  %s2288_s10 = int_to_ptr.vmem [resolvable:$false] %s2287_s10 }
  0x7a   : > { %498 = vmatpush1.bf16.msra.mxu0 %v1912_v8  ;;  %v374_v52 = vpack.c.bf16 %v354_v51, %v353_v50  ;;  %v1926_v54 = vld [vmem:[#allocation8] sm:$0xff]   ;;  %1715 = vmatprep.subr.bf16.mxu1 %v1925_v53  ;;  %v356_v56 = vld [vmem:[%s2593_s11 + $0xc8] sm:$0xff]  ;;  %v1929_v60 = vld [vmem:[#allocation8 + $0x50] sm:$0xff]   ;;  %s2289_s24 = scalar_lea.vmem %s2288_s10, 8192  ;;  %p2290_p5 = scmp.lt.s32.totalorder %s3058_s15, %s2288_s10 }
  0x7b   : > { %499 = vmatprep.subr.bf16.mxu0 %v1913_v9  ;;  %v355_v55 = vld [vmem:[%s2593_s11 + $0xc0] sm:$0xff]  ;;  %1716 = vmatpush3.bf16.msra.mxu1 %v1926_v54  ;;  %v1927_v57 = vld [vmem:[#allocation8 + $0x48] sm:$0xff]   ;;  %v1930_v61 = vld [vmem:[#allocation8 + $0x10] sm:$0xff]  }
  0x7c   : > { %v1928_v58 = vld [vmem:[#allocation8 + $0x8] sm:$0xff]   ;;  %v375_v59 = vpack.c.bf16 %v356_v56, %v355_v55  ;;  %1717 = vmatprep.subr.bf16.mxu1 %v1927_v57  ;;  %v357_v62 = vld [vmem:[%s2593_s11 + $0xd0] sm:$0xff]  ;;  %v358_v63 = vld [vmem:[%s2593_s11 + $0xd8] sm:$0xff] }
  0x7d   : > { %v1931_v1 = vld [vmem:[#allocation8 + $0x58] sm:$0xff]   ;;  %v376_v2 = vpack.c.bf16 %v358_v63, %v357_v62  ;;  %v1933_v4 = vld [vmem:[#allocation8 + $0x60] sm:$0xff]   ;;  %v360_v7 = vld [vmem:[%s2593_s11 + $0xe8] sm:$0xff] }
  0x7e   : > { %500 = vmatpush1.bf16.msra.mxu0 %v1915_v10  ;;  %v1932_v3 = vld [vmem:[#allocation8 + $0x18] sm:$0xff]   ;;  %v1934_v5 = vld [vmem:[#allocation8 + $0x20] sm:$0xff]   ;;  %v1935_v8 = vld [vmem:[#allocation8 + $0x68] sm:$0xff]  }
  0x7f   : > { %501 = vmatprep.subr.bf16.mxu0 %v1916_v11  ;;  %1718 = vmatpush3.bf16.msra.mxu1 %v1928_v58  ;;  %v359_v6 = vld [vmem:[%s2593_s11 + $0xe0] sm:$0xff]  ;;  %v1936_v10 = vld [vmem:[#allocation8 + $0x28] sm:$0xff]   ;;  %v1937_v11 = vld [vmem:[#allocation8 + $0x70] sm:$0xff]  }
  0x80   : > { %1719 = vmatprep.subr.bf16.mxu1 %v1929_v60  ;;  %v377_v9 = vpack.c.bf16 %v360_v7, %v359_v6  ;;  %v1940_v17 = vld [vmem:[#allocation8 + $0x38] sm:$0xff]  }
  0x82   : > { %502 = vmatpush1.bf16.msra.mxu0 %v1918_v12  ;;  %v1938_v12 = vld [vmem:[#allocation8 + $0x30] sm:$0xff]  }
  0x83   : > { %503 = vmatprep.subr.bf16.mxu0 %v1919_v13  ;;  %1720 = vmatpush3.bf16.msra.mxu1 %v1930_v61  ;;  %v361_v13 = vld [vmem:[%s2593_s11 + $0xf0] sm:$0xff] }
  0x84   : > { %1721 = vmatprep.subr.bf16.mxu1 %v1931_v1 }
  0x86   : > { %504 = vmatpush1.bf16.msra.mxu0 %v1921_v14  ;;  %v362_v14 = vld [vmem:[%s2593_s11 + $0xf8] sm:$0xff]  ;;  %s2283_s11 = scalar_lea.vmem %s3058_s15, 4096 }
  0x87   : > { %505 = vmatprep.subr.bf16.mxu0 %v1922_v15  ;;  %1722 = vmatpush3.bf16.msra.mxu1 %v1932_v3  ;;  %v378_v15 = vpack.c.bf16 %v362_v14, %v361_v13  ;;  %p2284_p11 = scmp.ne.s32.totalorder %s3058_s15, %s2283_s11  ;;  %p2291_p9 = scmp.lt.s32.totalorder %s2289_s24, %s2283_s11 }
  0x88   : > { %1723 = vmatprep.subr.bf16.mxu1 %v1933_v4 }
  0x89   : > { %p2285_p2 = pnand %p2284_p11, %p3126_p0  ;;  %p2292_p12 = por %p2291_p9, %p2290_p5 }
  0x8a   : > { %506 = vmatpush1.bf16.msra.mxu0 %v1924_v16  ;;  %v1939_v16 = vld [vmem:[#allocation8 + $0x78] sm:$0xff]  }
  0x8b   : > { %1724 = vmatpush3.bf16.msra.mxu1 %v1934_v5  ;;  %p2286_p3 = pneg %p2285_p2 }
  0x8c   : > { %1725 = vmatprep.subr.bf16.mxu1 %v1935_v8 }
  0x8d   : > { %524 = vmatmul.mubr.bf16.vlgmr.msra.gmra.mrb[0].mxu0 %v363_v19  ;;  %v395_v19 = vld [vmem:[%s3108_s3] sm:$0x3]  ;;  %p2293_p1 = pnand %p2292_p12, %p2286_p3 }
  0x8e   : > { %533 = vmatprep.mubr.bf16.mxu0 %v2362_v0  ;;  %v397_v21 = vmul.f32 %v396_v20, %v395_v19 }
  0x8f   : > { %1726 = vmatpush3.bf16.msra.mxu1 %v1936_v10 }
  0x90   : > { %1727 = vmatprep.subr.bf16.mxu1 %v1937_v11 }
  0x93   : > { %1728 = vmatpush3.bf16.msra.mxu1 %v1938_v12 }
  0x94   : > { %1729 = vmatprep.subr.bf16.mxu1 %v1939_v16 }
  0x95   : > { %534 = vmatmul.mubr.bf16.gmra.mrb[4].mxu0 %v364_v22  ;;  %v402_v22 = vshrl.u32 %v401_v18, 7 }
  0x96   : > { %543 = vmatprep.mubr.bf16.mxu0 %v2362_v0 }
  0x97   : > { %1730 = vmatpush3.bf16.msra.mxu1 %v1940_v17  ;;  %v403_v24 = vsub.s32 0, %v402_v22 }
  0x9d   : > { %544 = vmatmul.mubr.bf16.gmra.mrb[8].mxu0 %v365_v25  ;;  %v407_v25 = vsub.s32 1, %v402_v22 }
  0x9e   : > { %553 = vmatprep.mubr.bf16.mxu0 %v2362_v0 }
  0xa5   : > { %554 = vmatmul.mubr.bf16.gmra.mrb[12].mxu0 %v366_v28 }
  0xa6   : > { %563 = vmatprep.mubr.bf16.mxu0 %v2362_v0 }
  0xad   : > { %564 = vmatmul.mubr.bf16.gmra.mrb[16].mxu0 %v367_v31 }
  0xae   : > { %573 = vmatprep.mubr.bf16.mxu0 %v2362_v0 }
  0xb5   : > { %574 = vmatmul.mubr.bf16.gmra.mrb[20].mxu0 %v368_v34 }
  0xb6   : > { %583 = vmatprep.mubr.bf16.mxu0 %v2362_v0 }
  0xbd   : > { %584 = vmatmul.mubr.bf16.gmra.mrb[24].mxu0 %v369_v37 }
  0xbe   : > { %593 = vmatprep.mubr.bf16.mxu0 %v2362_v0 }
  0xc5   : > { %594 = vmatmul.mubr.bf16.gmra.mrb[28].mxu0 %v370_v40 }
  0xc6   : > { %603 = vmatprep.mubr.bf16.mxu0 %v2362_v0 }
  0xcd   : > { %604 = vmatmul.mubr.bf16.gmra.mrb[32].mxu0 %v371_v43 }
  0xce   : > { %613 = vmatprep.mubr.bf16.mxu0 %v2362_v0 }
  0xd5   : > { %614 = vmatmul.mubr.bf16.gmra.mrb[36].mxu0 %v372_v46 }
  0xd6   : > { %623 = vmatprep.mubr.bf16.mxu0 %v2362_v0 }
  0xdd   : > { %624 = vmatmul.mubr.bf16.gmra.mrb[40].mxu0 %v373_v49 }
  0xde   : > { %633 = vmatprep.mubr.bf16.mxu0 %v2362_v0 }
  0xe5   : > { %634 = vmatmul.mubr.bf16.gmra.mrb[44].mxu0 %v374_v52 }
  0xe6   : > { %643 = vmatprep.mubr.bf16.mxu0 %v2362_v0 }
  0xed   : > { %644 = vmatmul.mubr.bf16.gmra.mrb[48].mxu0 %v375_v59 }
  0xee   : > { %653 = vmatprep.mubr.bf16.mxu0 %v2362_v0 }
  0xf5   : > { %654 = vmatmul.mubr.bf16.gmra.mrb[52].mxu0 %v376_v2 }
  0xf6   : > { %663 = vmatprep.mubr.bf16.mxu0 %v2362_v0 }
  0xfd   : > { %664 = vmatmul.mubr.bf16.gmra.mrb[56].mxu0 %v377_v9 }
  0xfe   : > { %673 = vmatprep.mubr.bf16.mxu0 %v2362_v0  ;;  %v398_v0 = vld [vmem:[%s3109_s4] sm:$0x3] }
  0xff   : > { %v399_v23 = vadd.f32 %v398_v0, %v397_v21 }
 0x101   : > { %v2657_v26 = vrot.slane %v399_v23, %v403_v24  ;;  %v2659_v27 = vrot.slane %v399_v23, %v407_v25 }
 0x105   : > { %674 = vmatmul.mubr.bf16.gmra.mrb[60].mxu0 %v378_v15 }
 0x160   : > { %v525_v28 = vpop.f32.mrb[0].mxu0 }
 0x161   : > { %v2662_v29 = vadd.f32 %v525_v28, %v2657_v26  ;;  %v527_v30 = vpop.f32.mrb[1].mxu0 }
 0x162   : > { %v2665_v31 = vadd.f32 %v527_v30, %v2659_v27  ;;  %v529_v32 = vpop.f32.mrb[2].mxu0 }
 0x163   : > { %v1627_v33 = vmul.f32 -1.442695, %v2662_v29  ;;  %v2669_v34 = vadd.f32 %v529_v32, %v2657_v26  ;;  %v531_v35 = vpop.f32.mrb[3].mxu0 }
 0x164   : > { %v1628_v36 = vmul.f32 -1.442695, %v2665_v31  ;;  %v2673_v37 = vadd.f32 %v531_v35, %v2659_v27 }
 0x165   : > { %1941 = vpow2.f32 %v1627_v33  ;;  %v1629_v38 = vmul.f32 -1.442695, %v2669_v34 }
 0x166   : > { %1943 = vpow2.f32 %v1628_v36  ;;  %v1630_v39 = vmul.f32 -1.442695, %v2673_v37 }
 0x167   : > { %1945 = vpow2.f32 %v1629_v38 }
 0x168   : > { %1947 = vpow2.f32 %v1630_v39  ;;  %v535_v40 = vpop.f32.mrb[4].mxu0 }
 0x169   : > { %v2678_v41 = vadd.f32 %v535_v40, %v2657_v26  ;;  %v537_v42 = vpop.f32.mrb[5].mxu0 }
 0x16a   : > { %v2681_v43 = vadd.f32 %v537_v42, %v2659_v27  ;;  %v539_v44 = vpop.f32.mrb[6].mxu0 }
 0x16b   : > { %v1631_v45 = vmul.f32 -1.442695, %v2678_v41  ;;  %v2685_v46 = vadd.f32 %v539_v44, %v2657_v26  ;;  %v541_v47 = vpop.f32.mrb[7].mxu0 }
 0x16c   : > { %v1632_v48 = vmul.f32 -1.442695, %v2681_v43  ;;  %v2689_v49 = vadd.f32 %v541_v47, %v2659_v27 }
 0x16d   : > { %1949 = vpow2.f32 %v1631_v45  ;;  %v1633_v50 = vmul.f32 -1.442695, %v2685_v46 }
 0x16e   : > { %1951 = vpow2.f32 %v1632_v48  ;;  %v1634_v51 = vmul.f32 -1.442695, %v2689_v49 }
 0x16f   : > { %v1942_v52 = vpop.eup %1941  ;;  %1953 = vpow2.f32 %v1633_v50 }
 0x170   : > { %v1944_v53 = vpop.eup %1943  ;;  %v876_v54 = vadd.f32 1.0, %v1942_v52  ;;  %1955 = vpow2.f32 %v1634_v51  ;;  %v545_v55 = vpop.f32.mrb[8].mxu0 }
 0x171   : > { %v1946_v56 = vpop.eup %1945  ;;  %v877_v57 = vadd.f32 1.0, %v1944_v53  ;;  %v2694_v58 = vadd.f32 %v545_v55, %v2657_v26  ;;  %v547_v59 = vpop.f32.mrb[9].mxu0 }
 0x172   : > { %v1948_v60 = vpop.eup %1947  ;;  %1957 = vrcp.f32 %v876_v54  ;;  %v878_v61 = vadd.f32 1.0, %v1946_v56  ;;  %v2697_v62 = vadd.f32 %v547_v59, %v2659_v27  ;;  %v549_v63 = vpop.f32.mrb[10].mxu0 }
 0x173   : > { %1959 = vrcp.f32 %v877_v57  ;;  %v879_v1 = vadd.f32 1.0, %v1948_v60  ;;  %v1635_v2 = vmul.f32 -1.442695, %v2694_v58  ;;  %v2701_v3 = vadd.f32 %v549_v63, %v2657_v26  ;;  %v551_v4 = vpop.f32.mrb[11].mxu0 }
 0x174   : > { %1961 = vrcp.f32 %v878_v61  ;;  %v1636_v5 = vmul.f32 -1.442695, %v2697_v62  ;;  %v2705_v6 = vadd.f32 %v551_v4, %v2659_v27 }
 0x175   : > { %1963 = vrcp.f32 %v879_v1  ;;  %v1637_v7 = vmul.f32 -1.442695, %v2701_v3 }
 0x176   : > { %1965 = vpow2.f32 %v1635_v2  ;;  %v1638_v8 = vmul.f32 -1.442695, %v2705_v6 }
 0x177   : > { %v1950_v9 = vpop.eup %1949  ;;  %1967 = vpow2.f32 %v1636_v5 }
 0x178   : > { %v1952_v10 = vpop.eup %1951  ;;  %v880_v11 = vadd.f32 1.0, %v1950_v9  ;;  %1969 = vpow2.f32 %v1637_v7  ;;  %v555_v12 = vpop.f32.mrb[12].mxu0 }
 0x179   : > { %v1954_v13 = vpop.eup %1953  ;;  %v881_v14 = vadd.f32 1.0, %v1952_v10  ;;  %1971 = vpow2.f32 %v1638_v8  ;;  %v2710_v15 = vadd.f32 %v555_v12, %v2657_v26  ;;  %v557_v16 = vpop.f32.mrb[13].mxu0 }
 0x17a   : > { %v1956_v17 = vpop.eup %1955  ;;  %1973 = vrcp.f32 %v880_v11  ;;  %v882_v18 = vadd.f32 1.0, %v1954_v13  ;;  %v2713_v19 = vadd.f32 %v557_v16, %v2659_v27  ;;  %v559_v20 = vpop.f32.mrb[14].mxu0 }
 0x17b   : > { %1975 = vrcp.f32 %v881_v14  ;;  %v883_v21 = vadd.f32 1.0, %v1956_v17  ;;  %v1639_v22 = vmul.f32 -1.442695, %v2710_v15  ;;  %v2717_v0 = vadd.f32 %v559_v20, %v2657_v26  ;;  %v561_v23 = vpop.f32.mrb[15].mxu0 }
 0x17c   : > { %v1958_v24 = vpop.eup %1957  ;;  %1977 = vrcp.f32 %v882_v18  ;;  %v1640_v25 = vmul.f32 -1.442695, %v2713_v19  ;;  %v2721_v28 = vadd.f32 %v561_v23, %v2659_v27 }
 0x17d   : > { %v1960_v30 = vpop.eup %1959  ;;  %1979 = vrcp.f32 %v883_v21  ;;  %v1641_v32 = vmul.f32 -1.442695, %v2717_v0  ;;  %v1068_v38 = vmul.f32 %v1958_v24, %v2662_v29 }
 0x17e   : > { %v1962_v33 = vpop.eup %1961  ;;  %1981 = vpow2.f32 %v1639_v22  ;;  %v1642_v35 = vmul.f32 -1.442695, %v2721_v28  ;;  %v1069_v44 = vmul.f32 %v1960_v30, %v2665_v31 }
 0x17f   : > { %v1964_v36 = vpop.eup %1963  ;;  %v1070_v39 = vmul.f32 %v1962_v33, %v2669_v34  ;;  %1983 = vpow2.f32 %v1640_v25 }
 0x180   : > { %v1966_v40 = vpop.eup %1965  ;;  %1985 = vpow2.f32 %v1641_v32  ;;  %v565_v42 = vpop.f32.mrb[16].mxu0  ;;  %v1071_v45 = vmul.f32 %v1964_v36, %v2673_v37 }
 0x181   : > { %v1968_v47 = vpop.eup %1967  ;;  %v884_v48 = vadd.f32 1.0, %v1966_v40  ;;  %1987 = vpow2.f32 %v1642_v35  ;;  %v2730_v50 = vadd.f32 %v565_v42, %v2657_v26  ;;  %v567_v51 = vpop.f32.mrb[17].mxu0  ;;  %v1132_v52 = vpack.c.bf16 %v1070_v39, %v1068_v38 }
 0x182   : > { %v1970_v53 = vpop.eup %1969  ;;  %v885_v29 = vadd.f32 1.0, %v1968_v47  ;;  %v2733_v34 = vadd.f32 %v567_v51, %v2659_v27  ;;  %v569_v54 = vpop.f32.mrb[18].mxu0  ;;  %v1133_v55 = vpack.c.bf16 %v1071_v45, %v1069_v44 }
 0x183   : > { %v1972_v56 = vpop.eup %1971  ;;  %1989 = vrcp.f32 %v884_v48  ;;  %v886_v31 = vadd.f32 1.0, %v1970_v53  ;;  %v1643_v37 = vmul.f32 -1.442695, %v2730_v50  ;;  %v2737_v57 = vadd.f32 %v569_v54, %v2657_v26  ;;  %v571_v59 = vpop.f32.mrb[19].mxu0 }
 0x184   : > { %v1974_v60 = vpop.eup %1973  ;;  %1991 = vrcp.f32 %v885_v29  ;;  %v887_v61 = vadd.f32 1.0, %v1972_v56  ;;  %v1644_v63 = vmul.f32 -1.442695, %v2733_v34  ;;  %v2741_v1 = vadd.f32 %v571_v59, %v2659_v27  ;;  %1331 = vmatprep.mubr.bf16.mxu1 %v1133_v55 }
 0x185   : > { %v1976_v2 = vpop.eup %1975  ;;  %1993 = vrcp.f32 %v886_v31  ;;  %v1645_v4 = vmul.f32 -1.442695, %v2737_v57  ;;  %1332 = vmatmul.mubr.bf16.vlgmr.msra.gmra.mrb[0].mxu1 %v1132_v52  ;;  %v1072_v9 = vmul.f32 %v1974_v60, %v2678_v41 }
 0x186   : > { %v1978_v5 = vpop.eup %1977  ;;  %1995 = vrcp.f32 %v887_v61  ;;  %v1646_v7 = vmul.f32 -1.442695, %v2741_v1  ;;  %v1073_v12 = vmul.f32 %v1976_v2, %v2681_v43 }
 0x187   : > { %v1980_v8 = vpop.eup %1979  ;;  %v1074_v10 = vmul.f32 %v1978_v5, %v2685_v46  ;;  %1997 = vpow2.f32 %v1643_v37 }
 0x188   : > { %v1982_v11 = vpop.eup %1981  ;;  %v1075_v13 = vmul.f32 %v1980_v8, %v2689_v49  ;;  %1999 = vpow2.f32 %v1644_v63  ;;  %v575_v14 = vpop.f32.mrb[20].mxu0 }
 0x189   : > { %v1984_v16 = vpop.eup %1983  ;;  %v888_v17 = vadd.f32 1.0, %v1982_v11  ;;  %2001 = vpow2.f32 %v1645_v4  ;;  %v2750_v18 = vadd.f32 %v575_v14, %v2657_v26  ;;  %v577_v20 = vpop.f32.mrb[21].mxu0  ;;  %v1134_v21 = vpack.c.bf16 %v1074_v10, %v1072_v9 }
 0x18a   : > { %v1986_v22 = vpop.eup %1985  ;;  %v889_v41 = vadd.f32 1.0, %v1984_v16  ;;  %2003 = vpow2.f32 %v1646_v7  ;;  %v2753_v46 = vadd.f32 %v577_v20, %v2659_v27  ;;  %v579_v23 = vpop.f32.mrb[22].mxu0  ;;  %v1135_v43 = vpack.c.bf16 %v1075_v13, %v1073_v12 }
 0x18b   : > { %v1988_v24 = vpop.eup %1987  ;;  %2005 = vrcp.f32 %v888_v17  ;;  %v890_v49 = vadd.f32 1.0, %v1986_v22  ;;  %v1647_v25 = vmul.f32 -1.442695, %v2750_v18  ;;  %v2757_v30 = vadd.f32 %v579_v23, %v2657_v26  ;;  %v581_v32 = vpop.f32.mrb[23].mxu0 }
 0x18c   : > { %2007 = vrcp.f32 %v889_v41  ;;  %v891_v33 = vadd.f32 1.0, %v1988_v24  ;;  %v1648_v35 = vmul.f32 -1.442695, %v2753_v46  ;;  %v2761_v36 = vadd.f32 %v581_v32, %v2659_v27  ;;  %1339 = vmatprep.mubr.bf16.mxu1 %v1135_v43 }
 0x18d   : > { %v1990_v38 = vpop.eup %1989  ;;  %2009 = vrcp.f32 %v890_v49  ;;  %v1649_v39 = vmul.f32 -1.442695, %v2757_v30  ;;  %1340 = vmatmul.mubr.bf16.gmra.mrb[4].mxu1 %v1134_v21 }
 0x18e   : > { %v1992_v40 = vpop.eup %1991  ;;  %2011 = vrcp.f32 %v891_v33  ;;  %v1650_v42 = vmul.f32 -1.442695, %v2761_v36  ;;  %v1076_v47 = vmul.f32 %v1990_v38, %v2694_v58 }
 0x18f   : > { %v1994_v44 = vpop.eup %1993  ;;  %2013 = vpow2.f32 %v1647_v25  ;;  %v1077_v53 = vmul.f32 %v1992_v40, %v2697_v62 }
 0x190   : > { %v1996_v45 = vpop.eup %1995  ;;  %v1078_v48 = vmul.f32 %v1994_v44, %v2701_v3  ;;  %2015 = vpow2.f32 %v1648_v35  ;;  %v585_v51 = vpop.f32.mrb[24].mxu0 }
 0x191   : > { %v1998_v52 = vpop.eup %1997  ;;  %v1079_v29 = vmul.f32 %v1996_v45, %v2705_v6  ;;  %2017 = vpow2.f32 %v1649_v39  ;;  %v2770_v54 = vadd.f32 %v585_v51, %v2657_v26  ;;  %v587_v55 = vpop.f32.mrb[25].mxu0 }
 0x192   : > { %v2000_v56 = vpop.eup %1999  ;;  %v892_v31 = vadd.f32 1.0, %v1998_v52  ;;  %2019 = vpow2.f32 %v1650_v42  ;;  %v2773_v37 = vadd.f32 %v587_v55, %v2659_v27  ;;  %v589_v58 = vpop.f32.mrb[26].mxu0  ;;  %v1136_v3 = vpack.c.bf16 %v1078_v48, %v1076_v47 }
 0x193   : > { %v2002_v59 = vpop.eup %2001  ;;  %v893_v60 = vadd.f32 1.0, %v2000_v56  ;;  %v2776_v61 = vadd.f32 %v589_v58, %v2657_v26  ;;  %v591_v62 = vpop.f32.mrb[27].mxu0  ;;  %v1137_v6 = vpack.c.bf16 %v1079_v29, %v1077_v53  ;;  %v1651_v4 = vmul.f32 -1.442695, %v2770_v54 }
 0x194   : > { %v2004_v63 = vpop.eup %2003  ;;  %2021 = vrcp.f32 %v892_v31  ;;  %v894_v2 = vadd.f32 1.0, %v2002_v59  ;;  %v2780_v5 = vadd.f32 %v591_v62, %v2659_v27  ;;  %v1652_v9 = vmul.f32 -1.442695, %v2773_v37 }
 0x195   : > { %v2006_v7 = vpop.eup %2005  ;;  %2023 = vrcp.f32 %v893_v60  ;;  %v895_v8 = vadd.f32 1.0, %v2004_v63  ;;  %1347 = vmatprep.mubr.bf16.mxu1 %v1137_v6  ;;  %v1653_v11 = vmul.f32 -1.442695, %v2776_v61 }
 0x196   : > { %v2008_v10 = vpop.eup %2007  ;;  %2025 = vrcp.f32 %v894_v2  ;;  %1348 = vmatmul.mubr.bf16.gmra.mrb[8].mxu1 %v1136_v3  ;;  %v1654_v13 = vmul.f32 -1.442695, %v2780_v5  ;;  %v1080_v16 = vmul.f32 %v2006_v7, %v2710_v15 }
 0x197   : > { %v2010_v12 = vpop.eup %2009  ;;  %2027 = vrcp.f32 %v895_v8 }
 0x198   : > { %v2012_v14 = vpop.eup %2011  ;;  %v1082_v17 = vmul.f32 %v2010_v12, %v2717_v0  ;;  %2029 = vpow2.f32 %v1651_v4  ;;  %v595_v20 = vpop.f32.mrb[28].mxu0  ;;  %v1081_v0 = vmul.f32 %v2008_v10, %v2713_v19 }
 0x199   : > { %v2014_v21 = vpop.eup %2013  ;;  %v1083_v22 = vmul.f32 %v2012_v14, %v2721_v28  ;;  %2031 = vpow2.f32 %v1652_v9  ;;  %v2789_v41 = vadd.f32 %v595_v20, %v2657_v26  ;;  %v597_v23 = vpop.f32.mrb[29].mxu0 }
 0x19a   : > { %v2016_v43 = vpop.eup %2015  ;;  %v896_v24 = vadd.f32 1.0, %v2014_v21  ;;  %2033 = vpow2.f32 %v1653_v11  ;;  %v2792_v49 = vadd.f32 %v597_v23, %v2659_v27  ;;  %v599_v25 = vpop.f32.mrb[30].mxu0  ;;  %v1138_v15 = vpack.c.bf16 %v1082_v17, %v1080_v16 }
 0x19b   : > { %v2018_v32 = vpop.eup %2017  ;;  %v897_v33 = vadd.f32 1.0, %v2016_v43  ;;  %2035 = vpow2.f32 %v1654_v13  ;;  %v2796_v28 = vadd.f32 %v599_v25, %v2657_v26  ;;  %v601_v35 = vpop.f32.mrb[31].mxu0  ;;  %v1655_v40 = vmul.f32 -1.442695, %v2789_v41 }
 0x19c   : > { %v2020_v38 = vpop.eup %2019  ;;  %2037 = vrcp.f32 %v896_v24  ;;  %v898_v39 = vadd.f32 1.0, %v2018_v32  ;;  %v2800_v42 = vadd.f32 %v601_v35, %v2659_v27  ;;  %v1656_v45 = vmul.f32 -1.442695, %v2792_v49 }
 0x19d   : > { %2039 = vrcp.f32 %v897_v33  ;;  %v899_v44 = vadd.f32 1.0, %v2020_v38  ;;  %v1139_v47 = vpack.c.bf16 %v1083_v22, %v1081_v0  ;;  %v1657_v48 = vmul.f32 -1.442695, %v2796_v28 }
 0x19e   : > { %v2022_v19 = vpop.eup %2021  ;;  %2041 = vrcp.f32 %v898_v39  ;;  %v1658_v52 = vmul.f32 -1.442695, %v2800_v42 }
 0x19f   : > { %v2024_v51 = vpop.eup %2023  ;;  %2043 = vrcp.f32 %v899_v44  ;;  %1355 = vmatprep.mubr.bf16.mxu1 %v1139_v47  ;;  %v1084_v2 = vmul.f32 %v2022_v19, %v2730_v50 }
 0x1a0   : > { %v2026_v53 = vpop.eup %2025  ;;  %2045 = vpow2.f32 %v1655_v40  ;;  %1356 = vmatmul.mubr.bf16.gmra.mrb[12].mxu1 %v1138_v15  ;;  %v605_v29 = vpop.f32.mrb[32].mxu0  ;;  %v1085_v59 = vmul.f32 %v2024_v51, %v2733_v34 }
 0x1a1   : > { %v2028_v55 = vpop.eup %2027  ;;  %v1086_v56 = vmul.f32 %v2026_v53, %v2737_v57  ;;  %2047 = vpow2.f32 %v1656_v45  ;;  %v2807_v31 = vadd.f32 %v605_v29, %v2657_v26  ;;  %v607_v58 = vpop.f32.mrb[33].mxu0 }
 0x1a2   : > { %v2030_v3 = vpop.eup %2029  ;;  %v1087_v60 = vmul.f32 %v2028_v55, %v2741_v1  ;;  %2049 = vpow2.f32 %v1657_v48  ;;  %v2812_v62 = vadd.f32 %v607_v58, %v2659_v27  ;;  %v609_v6 = vpop.f32.mrb[34].mxu0 }
 0x1a3   : > { %v2032_v63 = vpop.eup %2031  ;;  %v900_v4 = vadd.f32 1.0, %v2030_v3  ;;  %2051 = vpow2.f32 %v1658_v52  ;;  %v2816_v57 = vadd.f32 %v609_v6, %v2657_v26  ;;  %v611_v7 = vpop.f32.mrb[35].mxu0  ;;  %v1659_v12 = vmul.f32 -1.442695, %v2807_v31 }
 0x1a4   : > { %v2034_v8 = vpop.eup %2033  ;;  %v901_v9 = vadd.f32 1.0, %v2032_v63  ;;  %v2819_v34 = vadd.f32 %v611_v7, %v2659_v27  ;;  %v1141_v1 = vpack.c.bf16 %v1087_v60, %v1085_v59  ;;  %v1140_v13 = vpack.c.bf16 %v1086_v56, %v1084_v2 }
 0x1a5   : > { %v2036_v10 = vpop.eup %2035  ;;  %2053 = vrcp.f32 %v900_v4  ;;  %v902_v11 = vadd.f32 1.0, %v2034_v8  ;;  %v1660_v16 = vmul.f32 -1.442695, %v2812_v62  ;;  %v1661_v20 = vmul.f32 -1.442695, %v2816_v57 }
 0x1a6   : > { %v2038_v14 = vpop.eup %2037  ;;  %2055 = vrcp.f32 %v901_v9  ;;  %v903_v50 = vadd.f32 1.0, %v2036_v10  ;;  %1363 = vmatprep.mubr.bf16.mxu1 %v1141_v1  ;;  %v1662_v22 = vmul.f32 -1.442695, %v2819_v34 }
 0x1a7   : > { %v2040_v17 = vpop.eup %2039  ;;  %2057 = vrcp.f32 %v902_v11  ;;  %v1088_v19 = vmul.f32 %v2038_v14, %v2750_v18 }
 0x1a8   : > { %v2042_v21 = vpop.eup %2041  ;;  %2059 = vrcp.f32 %v903_v50  ;;  %1364 = vmatmul.mubr.bf16.gmra.mrb[16].mxu1 %v1140_v13  ;;  %v615_v23 = vpop.f32.mrb[36].mxu0  ;;  %v1089_v39 = vmul.f32 %v2040_v17, %v2753_v46 }
 0x1a9   : > { %v2044_v43 = vpop.eup %2043  ;;  %2061 = vpow2.f32 %v1659_v12  ;;  %v2826_v24 = vadd.f32 %v615_v23, %v2657_v26  ;;  %v617_v25 = vpop.f32.mrb[37].mxu0  ;;  %v1090_v32 = vmul.f32 %v2042_v21, %v2757_v30 }
 0x1aa   : > { %v2046_v15 = vpop.eup %2045  ;;  %v1091_v0 = vmul.f32 %v2044_v43, %v2761_v36  ;;  %2063 = vpow2.f32 %v1660_v16  ;;  %v2831_v33 = vadd.f32 %v617_v25, %v2659_v27  ;;  %v619_v35 = vpop.f32.mrb[38].mxu0 }
 0x1ab   : > { %v2048_v38 = vpop.eup %2047  ;;  %v904_v40 = vadd.f32 1.0, %v2046_v15  ;;  %2065 = vpow2.f32 %v1661_v20  ;;  %v2835_v44 = vadd.f32 %v619_v35, %v2657_v26  ;;  %v621_v45 = vpop.f32.mrb[39].mxu0  ;;  %v1663_v52 = vmul.f32 -1.442695, %v2826_v24 }
 0x1ac   : > { %v2050_v47 = vpop.eup %2049  ;;  %v905_v30 = vadd.f32 1.0, %v2048_v38  ;;  %2067 = vpow2.f32 %v1662_v22  ;;  %v2839_v36 = vadd.f32 %v621_v45, %v2659_v27  ;;  %v1143_v46 = vpack.c.bf16 %v1091_v0, %v1089_v39 }
 0x1ad   : > { %v2052_v48 = vpop.eup %2051  ;;  %2069 = vrcp.f32 %v904_v40  ;;  %v906_v51 = vadd.f32 1.0, %v2050_v47  ;;  %v1664_v29 = vmul.f32 -1.442695, %v2831_v33  ;;  %v1142_v55 = vpack.c.bf16 %v1090_v32, %v1088_v19 }
 0x1ae   : > { %2071 = vrcp.f32 %v905_v30  ;;  %v907_v53 = vadd.f32 1.0, %v2052_v48  ;;  %v1665_v18 = vmul.f32 -1.442695, %v2835_v44  ;;  %1371 = vmatprep.mubr.bf16.mxu1 %v1143_v46  ;;  %v1666_v3 = vmul.f32 -1.442695, %v2839_v36 }
 0x1af   : > { %v2054_v56 = vpop.eup %2053  ;;  %2073 = vrcp.f32 %v906_v51 }
 0x1b0   : > { %v2056_v58 = vpop.eup %2055  ;;  %2075 = vrcp.f32 %v907_v53  ;;  %1372 = vmatmul.mubr.bf16.gmra.mrb[20].mxu1 %v1142_v55  ;;  %v625_v59 = vpop.f32.mrb[40].mxu0 }
 0x1b1   : > { %v2058_v60 = vpop.eup %2057  ;;  %2077 = vpow2.f32 %v1663_v52  ;;  %v2846_v6 = vadd.f32 %v625_v59, %v2657_v26  ;;  %v627_v63 = vpop.f32.mrb[41].mxu0  ;;  %v1093_v4 = vmul.f32 %v2056_v58, %v2773_v37  ;;  %v1092_v37 = vmul.f32 %v2054_v56, %v2770_v54 }
 0x1b2   : > { %v2060_v2 = vpop.eup %2059  ;;  %v1094_v7 = vmul.f32 %v2058_v60, %v2776_v61  ;;  %2079 = vpow2.f32 %v1664_v29  ;;  %v2851_v8 = vadd.f32 %v627_v63, %v2659_v27  ;;  %v629_v9 = vpop.f32.mrb[42].mxu0 }
 0x1b3   : > { %v2062_v1 = vpop.eup %2061  ;;  %v1095_v10 = vmul.f32 %v2060_v2, %v2780_v5  ;;  %2081 = vpow2.f32 %v1665_v18  ;;  %v1667_v11 = vmul.f32 -1.442695, %v2846_v6  ;;  %v2856_v12 = vadd.f32 %v629_v9, %v2657_v26  ;;  %v631_v13 = vpop.f32.mrb[43].mxu0 }
 0x1b4   : > { %v2064_v14 = vpop.eup %2063  ;;  %v908_v50 = vadd.f32 1.0, %v2062_v1  ;;  %2083 = vpow2.f32 %v1666_v3  ;;  %v2860_v61 = vadd.f32 %v631_v13, %v2659_v27  ;;  %v1668_v22 = vmul.f32 -1.442695, %v2851_v8 }
 0x1b5   : > { %v2066_v16 = vpop.eup %2065  ;;  %v909_v17 = vadd.f32 1.0, %v2064_v14  ;;  %2085 = vpow2.f32 %v1667_v11  ;;  %v1145_v20 = vpack.c.bf16 %v1095_v10, %v1093_v4  ;;  %v1144_v23 = vpack.c.bf16 %v1094_v7, %v1092_v37 }
 0x1b6   : > { %v2068_v5 = vpop.eup %2067  ;;  %2087 = vrcp.f32 %v908_v50  ;;  %v910_v21 = vadd.f32 1.0, %v2066_v16  ;;  %v1669_v54 = vmul.f32 -1.442695, %v2856_v12  ;;  %v1670_v32 = vmul.f32 -1.442695, %v2860_v61 }
 0x1b7   : > { %v2070_v43 = vpop.eup %2069  ;;  %2089 = vrcp.f32 %v909_v17  ;;  %v911_v25 = vadd.f32 1.0, %v2068_v5  ;;  %1379 = vmatprep.mubr.bf16.mxu1 %v1145_v20 }
 0x1b8   : > { %v2072_v15 = vpop.eup %2071  ;;  %2091 = vrcp.f32 %v910_v21  ;;  %1380 = vmatmul.mubr.bf16.gmra.mrb[24].mxu1 %v1144_v23  ;;  %v635_v0 = vpop.f32.mrb[44].mxu0  ;;  %v1096_v29 = vmul.f32 %v2070_v43, %v2789_v41 }
 0x1b9   : > { %v2074_v35 = vpop.eup %2073  ;;  %2093 = vrcp.f32 %v911_v25  ;;  %v2866_v38 = vadd.f32 %v635_v0, %v2657_v26  ;;  %v637_v39 = vpop.f32.mrb[45].mxu0  ;;  %v1097_v45 = vmul.f32 %v2072_v15, %v2792_v49 }
 0x1ba   : > { %v2076_v40 = vpop.eup %2075  ;;  %v1098_v47 = vmul.f32 %v2074_v35, %v2796_v28  ;;  %2095 = vpow2.f32 %v1668_v22  ;;  %v639_v19 = vpop.f32.mrb[46].mxu0  ;;  %v2873_v52 = vadd.f32 %v637_v39, %v2659_v27 }
 0x1bb   : > { %v2078_v30 = vpop.eup %2077  ;;  %v1099_v48 = vmul.f32 %v2076_v40, %v2800_v42  ;;  %2097 = vpow2.f32 %v1669_v54  ;;  %v1671_v51 = vmul.f32 -1.442695, %v2866_v38  ;;  %v641_v46 = vpop.f32.mrb[47].mxu0  ;;  %v2877_v49 = vadd.f32 %v639_v19, %v2657_v26 }
 0x1bc   : > { %v2080_v53 = vpop.eup %2079  ;;  %v912_v55 = vadd.f32 1.0, %v2078_v30  ;;  %2099 = vpow2.f32 %v1670_v32  ;;  %v2880_v42 = vadd.f32 %v641_v46, %v2659_v27  ;;  %v1146_v59 = vpack.c.bf16 %v1098_v47, %v1096_v29 }
 0x1bd   : > { %v2082_v28 = vpop.eup %2081  ;;  %v913_v56 = vadd.f32 1.0, %v2080_v53  ;;  %2101 = vpow2.f32 %v1671_v51  ;;  %v1147_v18 = vpack.c.bf16 %v1099_v48, %v1097_v45  ;;  %v1672_v41 = vmul.f32 -1.442695, %v2873_v52 }
 0x1be   : > { %v2084_v58 = vpop.eup %2083  ;;  %2103 = vrcp.f32 %v912_v55  ;;  %v914_v3 = vadd.f32 1.0, %v2082_v28  ;;  %v1673_v7 = vmul.f32 -1.442695, %v2877_v49  ;;  %v1674_v10 = vmul.f32 -1.442695, %v2880_v42 }
 0x1bf   : > { %v2086_v60 = vpop.eup %2085  ;;  %2105 = vrcp.f32 %v913_v56  ;;  %v915_v63 = vadd.f32 1.0, %v2084_v58  ;;  %1387 = vmatprep.mubr.bf16.mxu1 %v1147_v18 }
 0x1c0   : > { %v2088_v2 = vpop.eup %2087  ;;  %2107 = vrcp.f32 %v914_v3  ;;  %v916_v4 = vadd.f32 1.0, %v2086_v60  ;;  %1388 = vmatmul.mubr.bf16.gmra.mrb[28].mxu1 %v1146_v59  ;;  %v645_v9 = vpop.f32.mrb[48].mxu0 }
 0x1c1   : > { %v2090_v1 = vpop.eup %2089  ;;  %2109 = vrcp.f32 %v915_v63  ;;  %v2886_v11 = vadd.f32 %v645_v9, %v2657_v26  ;;  %v647_v13 = vpop.f32.mrb[49].mxu0  ;;  %v1100_v37 = vmul.f32 %v2088_v2, %v2807_v31 }
 0x1c2   : > { %v2092_v14 = vpop.eup %2091  ;;  %2111 = vrcp.f32 %v916_v4  ;;  %v649_v50 = vpop.f32.mrb[50].mxu0  ;;  %v2892_v5 = vadd.f32 %v647_v13, %v2659_v27  ;;  %v1101_v23 = vmul.f32 %v2090_v1, %v2812_v62 }
 0x1c3   : > { %v2094_v16 = vpop.eup %2093  ;;  %v1102_v17 = vmul.f32 %v2092_v14, %v2816_v57  ;;  %2113 = vpow2.f32 %v1672_v41  ;;  %v1675_v20 = vmul.f32 -1.442695, %v2886_v11  ;;  %v651_v21 = vpop.f32.mrb[51].mxu0  ;;  %v2897_v31 = vadd.f32 %v649_v50, %v2657_v26 }
 0x1c4   : > { %v2096_v22 = vpop.eup %2095  ;;  %v1103_v43 = vmul.f32 %v2094_v16, %v2819_v34  ;;  %2115 = vpow2.f32 %v1673_v7  ;;  %v2900_v57 = vadd.f32 %v651_v21, %v2659_v27  ;;  %v1676_v34 = vmul.f32 -1.442695, %v2892_v5 }
 0x1c5   : > { %v2098_v25 = vpop.eup %2097  ;;  %v917_v54 = vadd.f32 1.0, %v2096_v22  ;;  %2117 = vpow2.f32 %v1674_v10  ;;  %v1148_v15 = vpack.c.bf16 %v1102_v17, %v1100_v37  ;;  %v1677_v47 = vmul.f32 -1.442695, %v2897_v31 }
 0x1c6   : > { %v2100_v32 = vpop.eup %2099  ;;  %v918_v0 = vadd.f32 1.0, %v2098_v25  ;;  %2119 = vpow2.f32 %v1675_v20  ;;  %v1149_v35 = vpack.c.bf16 %v1103_v43, %v1101_v23  ;;  %v1678_v48 = vmul.f32 -1.442695, %v2900_v57 }
 0x1c7   : > { %v2102_v39 = vpop.eup %2101  ;;  %2121 = vrcp.f32 %v917_v54  ;;  %v919_v62 = vadd.f32 1.0, %v2100_v32 }
 0x1c8   : > { %v2104_v40 = vpop.eup %2103  ;;  %2123 = vrcp.f32 %v918_v0  ;;  %v920_v45 = vadd.f32 1.0, %v2102_v39  ;;  %1395 = vmatprep.mubr.bf16.mxu1 %v1149_v35  ;;  %v655_v19 = vpop.f32.mrb[52].mxu0 }
 0x1c9   : > { %v2106_v30 = vpop.eup %2105  ;;  %2125 = vrcp.f32 %v919_v62  ;;  %1396 = vmatmul.mubr.bf16.gmra.mrb[32].mxu1 %v1148_v15  ;;  %v2906_v51 = vadd.f32 %v655_v19, %v2657_v26  ;;  %v657_v46 = vpop.f32.mrb[53].mxu0  ;;  %v1104_v29 = vmul.f32 %v2104_v40, %v2826_v24 }
 0x1ca   : > { %v2108_v53 = vpop.eup %2107  ;;  %2127 = vrcp.f32 %v920_v45  ;;  %v2910_v55 = vadd.f32 %v657_v46, %v2659_v27  ;;  %v659_v28 = vpop.f32.mrb[54].mxu0  ;;  %v1105_v18 = vmul.f32 %v2106_v30, %v2831_v33 }
 0x1cb   : > { %v2110_v56 = vpop.eup %2109  ;;  %v1106_v58 = vmul.f32 %v2108_v53, %v2835_v44  ;;  %2129 = vpow2.f32 %v1676_v34  ;;  %v1679_v3 = vmul.f32 -1.442695, %v2906_v51  ;;  %v661_v59 = vpop.f32.mrb[55].mxu0  ;;  %v2918_v41 = vadd.f32 %v659_v28, %v2657_v26 }
 0x1cc   : > { %v2112_v60 = vpop.eup %2111  ;;  %v1107_v63 = vmul.f32 %v2110_v56, %v2839_v36  ;;  %2131 = vpow2.f32 %v1677_v47  ;;  %v1680_v24 = vmul.f32 -1.442695, %v2910_v55  ;;  %v2921_v4 = vadd.f32 %v661_v59, %v2659_v27 }
 0x1cd   : > { %v2114_v2 = vpop.eup %2113  ;;  %2133 = vpow2.f32 %v1678_v48  ;;  %v1150_v33 = vpack.c.bf16 %v1106_v58, %v1104_v29  ;;  %v1681_v14 = vmul.f32 -1.442695, %v2918_v41  ;;  %v1108_v54 = vmul.f32 %v2112_v60, %v2846_v6 }
 0x1ce   : > { %v2116_v44 = vpop.eup %2115  ;;  %v921_v7 = vadd.f32 1.0, %v2114_v2  ;;  %2135 = vpow2.f32 %v1679_v3  ;;  %v1151_v9 = vpack.c.bf16 %v1107_v63, %v1105_v18  ;;  %v1682_v17 = vmul.f32 -1.442695, %v2921_v4 }
 0x1cf   : > { %v2118_v1 = vpop.eup %2117  ;;  %v922_v10 = vadd.f32 1.0, %v2116_v44  ;;  %2137 = vpow2.f32 %v1680_v24 }
 0x1d0   : > { %v2120_v36 = vpop.eup %2119  ;;  %2139 = vrcp.f32 %v921_v7  ;;  %v923_v13 = vadd.f32 1.0, %v2118_v1  ;;  %1403 = vmatprep.mubr.bf16.mxu1 %v1151_v9  ;;  %v665_v37 = vpop.f32.mrb[56].mxu0 }
 0x1d1   : > { %v2122_v50 = vpop.eup %2121  ;;  %2141 = vrcp.f32 %v922_v10  ;;  %v924_v16 = vadd.f32 1.0, %v2120_v36  ;;  %1404 = vmatmul.mubr.bf16.gmra.mrb[36].mxu1 %v1150_v33  ;;  %v2926_v20 = vadd.f32 %v665_v37, %v2657_v26  ;;  %v667_v21 = vpop.f32.mrb[57].mxu0 }
 0x1d2   : > { %v2124_v22 = vpop.eup %2123  ;;  %2143 = vrcp.f32 %v923_v13  ;;  %v2929_v23 = vadd.f32 %v667_v21, %v2659_v27  ;;  %v669_v43 = vpop.f32.mrb[58].mxu0  ;;  %v1109_v39 = vmul.f32 %v2122_v50, %v2851_v8 }
 0x1d3   : > { %v2126_v25 = vpop.eup %2125  ;;  %v1110_v15 = vmul.f32 %v2124_v22, %v2856_v12  ;;  %2145 = vrcp.f32 %v924_v16  ;;  %v1683_v32 = vmul.f32 -1.442695, %v2926_v20  ;;  %v671_v0 = vpop.f32.mrb[59].mxu0  ;;  %v2938_v45 = vadd.f32 %v669_v43, %v2657_v26 }
 0x1d4   : > { %v2128_v35 = vpop.eup %2127  ;;  %v1111_v62 = vmul.f32 %v2126_v25, %v2860_v61  ;;  %2147 = vpow2.f32 %v1681_v14  ;;  %v1684_v34 = vmul.f32 -1.442695, %v2929_v23  ;;  %v2941_v19 = vadd.f32 %v671_v0, %v2659_v27 }
 0x1d5   : > { %v2130_v40 = vpop.eup %2129  ;;  %2149 = vpow2.f32 %v1682_v17  ;;  %v1152_v6 = vpack.c.bf16 %v1110_v15, %v1108_v54  ;;  %v1685_v56 = vmul.f32 -1.442695, %v2938_v45  ;;  %v1112_v9 = vmul.f32 %v2128_v35, %v2866_v38 }
 0x1d6   : > { %v2132_v47 = vpop.eup %2131  ;;  %v925_v12 = vadd.f32 1.0, %v2130_v40  ;;  %2151 = vpow2.f32 %v1683_v32  ;;  %v1153_v30 = vpack.c.bf16 %v1111_v62, %v1109_v39  ;;  %v1686_v60 = vmul.f32 -1.442695, %v2941_v19 }
 0x1d7   : > { %v2134_v48 = vpop.eup %2133  ;;  %v926_v8 = vadd.f32 1.0, %v2132_v47  ;;  %2153 = vpow2.f32 %v1684_v34 }
 0x1d8   : > { %v2136_v61 = vpop.eup %2135  ;;  %2155 = vrcp.f32 %v925_v12  ;;  %v927_v46 = vadd.f32 1.0, %v2134_v48  ;;  %1411 = vmatprep.mubr.bf16.mxu1 %v1153_v30  ;;  %v675_v53 = vpop.f32.mrb[60].mxu0 }
 0x1d9   : > { %v2138_v29 = vpop.eup %2137  ;;  %2157 = vrcp.f32 %v926_v8  ;;  %v928_v28 = vadd.f32 1.0, %v2136_v61  ;;  %1412 = vmatmul.mubr.bf16.gmra.mrb[40].mxu1 %v1152_v6  ;;  %v2945_v18 = vadd.f32 %v675_v53, %v2657_v26  ;;  %v677_v58 = vpop.f32.mrb[61].mxu0 }
 0x1da   : > { %v2140_v3 = vpop.eup %2139  ;;  %2159 = vrcp.f32 %v927_v46  ;;  %v929_v59 = vadd.f32 1.0, %v2138_v29  ;;  %v2949_v63 = vadd.f32 %v677_v58, %v2659_v27  ;;  %v679_v24 = vpop.f32.mrb[62].mxu0 }
 0x1db   : > { %v2142_v2 = vpop.eup %2141  ;;  %2161 = vrcp.f32 %v928_v28  ;;  %v1687_v33 = vmul.f32 -1.442695, %v2945_v18  ;;  %v681_v44 = vpop.f32.mrb[63].mxu0  ;;  %v1113_v13 = vmul.f32 %v2140_v3, %v2873_v52  ;;  %v2958_v37 = vadd.f32 %v679_v24, %v2657_v26 }
 0x1dc   : > { %v2144_v7 = vpop.eup %2143  ;;  %v1114_v1 = vmul.f32 %v2142_v2, %v2877_v49  ;;  %2163 = vrcp.f32 %v929_v59  ;;  %v1688_v10 = vmul.f32 -1.442695, %v2949_v63  ;;  %v2961_v16 = vadd.f32 %v681_v44, %v2659_v27 }
 0x1dd   : > { %v2146_v36 = vpop.eup %2145  ;;  %v1115_v14 = vmul.f32 %v2144_v7, %v2880_v42  ;;  %2165 = vpow2.f32 %v1685_v56  ;;  %v1689_v42 = vmul.f32 -1.442695, %v2958_v37 }
 0x1de   : > { %v2148_v50 = vpop.eup %2147  ;;  %2167 = vpow2.f32 %v1686_v60  ;;  %v1154_v38 = vpack.c.bf16 %v1114_v1, %v1112_v9  ;;  %v1690_v25 = vmul.f32 -1.442695, %v2961_v16  ;;  %v1116_v15 = vmul.f32 %v2146_v36, %v2886_v11 }
 0x1df   : > { %v2150_v17 = vpop.eup %2149  ;;  %v930_v49 = vadd.f32 1.0, %v2148_v50  ;;  %2169 = vpow2.f32 %v1687_v33  ;;  %v1155_v21 = vpack.c.bf16 %v1115_v14, %v1113_v13 }
 0x1e0   : > { %v2152_v22 = vpop.eup %2151  ;;  %v931_v43 = vadd.f32 1.0, %v2150_v17  ;;  %2171 = vpow2.f32 %v1688_v10 }
 0x1e1   : > { %v2154_v52 = vpop.eup %2153  ;;  %2173 = vrcp.f32 %v930_v49  ;;  %1419 = vmatprep.mubr.bf16.mxu1 %v1155_v21  ;;  %v932_v0 = vadd.f32 1.0, %v2152_v22  ;;  %v2984_v21 = vld [vmem:[%s3111_s6] ss:$0 sm:$0xff] }
 0x1e2   : > { %v2156_v26 = vpop.eup %2155  ;;  %2175 = vrcp.f32 %v931_v43  ;;  %1420 = vmatmul.mubr.bf16.gmra.mrb[44].mxu1 %v1154_v38  ;;  %v933_v34 = vadd.f32 1.0, %v2154_v52 }
 0x1e3   : > { %v2158_v27 = vpop.eup %2157  ;;  %v1117_v39 = vmul.f32 %v2156_v26, %v2892_v5  ;;  %2177 = vpow2.f32 %v1689_v42 }
 0x1e4   : > { %v2160_v54 = vpop.eup %2159  ;;  %v1118_v32 = vmul.f32 %v2158_v27, %v2897_v31  ;;  %2179 = vpow2.f32 %v1690_v25 }
 0x1e5   : > { %v2162_v35 = vpop.eup %2161  ;;  %v1119_v62 = vmul.f32 %v2160_v54, %v2900_v57  ;;  %2181 = vrcp.f32 %v932_v0 }
 0x1e6   : > { %v2164_v40 = vpop.eup %2163  ;;  %v1156_v6 = vpack.c.bf16 %v1118_v32, %v1116_v15  ;;  %2183 = vrcp.f32 %v933_v34  ;;  %v1120_v61 = vmul.f32 %v2162_v35, %v2906_v51 }
 0x1e7   : > { %v2166_v47 = vpop.eup %2165  ;;  %v1157_v12 = vpack.c.bf16 %v1119_v62, %v1117_v39  ;;  %v1121_v29 = vmul.f32 %v2164_v40, %v2910_v55 }
 0x1e8   : > { %v2168_v30 = vpop.eup %2167  ;;  %v934_v48 = vadd.f32 1.0, %v2166_v47 }
 0x1e9   : > { %v2170_v8 = vpop.eup %2169  ;;  %v935_v11 = vadd.f32 1.0, %v2168_v30  ;;  %1427 = vmatprep.mubr.bf16.mxu1 %v1157_v12 }
 0x1ea   : > { %v2172_v31 = vpop.eup %2171  ;;  %2185 = vrcp.f32 %v934_v48  ;;  %1428 = vmatmul.mubr.bf16.gmra.mrb[48].mxu1 %v1156_v6  ;;  %v936_v53 = vadd.f32 1.0, %v2170_v8 }
 0x1eb   : > { %v2174_v5 = vpop.eup %2173  ;;  %2187 = vrcp.f32 %v935_v11  ;;  %v937_v56 = vadd.f32 1.0, %v2172_v31 }
 0x1ec   : > { %v2176_v57 = vpop.eup %2175  ;;  %v1122_v46 = vmul.f32 %v2174_v5, %v2918_v41  ;;  %2189 = vrcp.f32 %v936_v53 }
 0x1ed   : > { %v1123_v28 = vmul.f32 %v2176_v57, %v2921_v4  ;;  %v2178_v3 = vpop.eup %2177  ;;  %2191 = vrcp.f32 %v937_v56 }
 0x1ee   : > { %v1158_v58 = vpack.c.bf16 %v1122_v46, %v1120_v61  ;;  %v2180_v60 = vpop.eup %2179  ;;  %v938_v24 = vadd.f32 1.0, %v2178_v3 }
 0x1ef   : > { %v1159_v59 = vpack.c.bf16 %v1123_v28, %v1121_v29  ;;  %v939_v2 = vadd.f32 1.0, %v2180_v60  ;;  %v2182_v33 = vpop.eup %2181 }
 0x1f0   : > { %2193 = vrcp.f32 %v938_v24  ;;  %v2184_v51 = vpop.eup %2183  ;;  %v1124_v55 = vmul.f32 %v2182_v33, %v2926_v20 }
 0x1f1   : > { %1435 = vmatprep.mubr.bf16.mxu1 %v1159_v59  ;;  %2195 = vrcp.f32 %v939_v2  ;;  %v1125_v7 = vmul.f32 %v2184_v51, %v2929_v23 }
 0x1f2   : > { %1436 = vmatmul.mubr.bf16.gmra.mrb[52].mxu1 %v1158_v58 }
 0x1f4   : > { %v2186_v41 = vpop.eup %2185 }
 0x1f5   : > { %v2188_v44 = vpop.eup %2187  ;;  %v1126_v4 = vmul.f32 %v2186_v41, %v2938_v45 }
 0x1f6   : > { %v1127_v9 = vmul.f32 %v2188_v44, %v2941_v19  ;;  %v2190_v36 = vpop.eup %2189 }
 0x1f7   : > { %v1160_v1 = vpack.c.bf16 %v1126_v4, %v1124_v55  ;;  %v2192_v13 = vpop.eup %2191  ;;  %v1128_v38 = vmul.f32 %v2190_v36, %v2945_v18 }
 0x1f8   : > { %v1161_v10 = vpack.c.bf16 %v1127_v9, %v1125_v7  ;;  %v1129_v20 = vmul.f32 %v2192_v13, %v2949_v63 }
 0x1fa   : > { %1443 = vmatprep.mubr.bf16.mxu1 %v1161_v10  ;;  %v2194_v14 = vpop.eup %2193 }
 0x1fb   : > { %1444 = vmatmul.mubr.bf16.gmra.mrb[56].mxu1 %v1160_v1  ;;  %v2196_v50 = vpop.eup %2195  ;;  %v1130_v17 = vmul.f32 %v2194_v14, %v2958_v37 }
 0x1fc   : > { %v1131_v45 = vmul.f32 %v2196_v50, %v2961_v16 }
 0x1fd   : > { %v1162_v23 = vpack.c.bf16 %v1130_v17, %v1128_v38 }
 0x1fe   : > { %v1163_v49 = vpack.c.bf16 %v1131_v45, %v1129_v20 }
 0x200   : > { %1451 = vmatprep.mubr.bf16.mxu1 %v1163_v49 }
 0x203   : > { %1452 = vmatmul.mubr.bf16.gmra.mrb[60].mxu1 %v1162_v23 }
 0x258   : > { %v1731_v19 = vpop.f32.mrb[0].mxu1 }
 0x259   : > { %v1732_v22 = vpop.f32.mrb[1].mxu1 }
 0x25a   : > { %v1733_v43 = vadd.f32 %v1732_v22, %v1731_v19  ;;  %v1734_v18 = vpop.f32.mrb[2].mxu1 }
 0x25b   : > { %v1735_v52 = vpop.f32.mrb[3].mxu1 }
 0x25c   : > { %v1334_v37 = vadd.f32 %v1733_v43, %v2984_v21  ;;  %v1736_v42 = vadd.f32 %v1735_v52, %v1734_v18 }
 0x25e   : > { %1460 = vst [vmem:[%s2989_s13] sm:$0xff] %v1334_v37  ;;  %v1337_v63 = vadd.f32 %v1736_v42, %v2984_v21 }
 0x260   : > { %1461 = vst [vmem:[%s2989_s13 + $0x8] sm:$0xff] %v1337_v63  ;;  %v1737_v16 = vpop.f32.mrb[4].mxu1 }
 0x261   : > { %v1738_v26 = vpop.f32.mrb[5].mxu1 }
 0x262   : > { %v1739_v25 = vadd.f32 %v1738_v26, %v1737_v16  ;;  %v1740_v27 = vpop.f32.mrb[6].mxu1 }
 0x263   : > { %v1741_v54 = vpop.f32.mrb[7].mxu1 }
 0x264   : > { %v1342_v15 = vadd.f32 %v1739_v25, %v2984_v21  ;;  %v1742_v32 = vadd.f32 %v1741_v54, %v1740_v27 }
 0x266   : > { %1462 = vst [vmem:[%s2989_s13 + $0x10] sm:$0xff] %v1342_v15  ;;  %v1345_v0 = vadd.f32 %v1742_v32, %v2984_v21 }
 0x268   : > { %1463 = vst [vmem:[%s2989_s13 + $0x18] sm:$0xff] %v1345_v0 }
 0x269   : > { %v1743_v35 = vpop.f32.mrb[8].mxu1 }
 0x26a   : > { %v1744_v39 = vpop.f32.mrb[9].mxu1 }
 0x26b   : > { %v1745_v62 = vadd.f32 %v1744_v39, %v1743_v35  ;;  %v1746_v34 = vpop.f32.mrb[10].mxu1 }
 0x26c   : > { %v1747_v40 = vpop.f32.mrb[11].mxu1 }
 0x26d   : > { %v1350_v6 = vadd.f32 %v1745_v62, %v2984_v21  ;;  %v1748_v47 = vadd.f32 %v1747_v40, %v1746_v34 }
 0x26f   : > { %1464 = vst [vmem:[%s2989_s13 + $0x20] sm:$0xff] %v1350_v6  ;;  %v1353_v12 = vadd.f32 %v1748_v47, %v2984_v21 }
 0x271   : > { %1465 = vst [vmem:[%s2989_s13 + $0x28] sm:$0xff] %v1353_v12 }
 0x273   : > { %v1749_v30 = vpop.f32.mrb[12].mxu1 }
 0x274   : > { %v1750_v48 = vpop.f32.mrb[13].mxu1 }
 0x275   : > { %v1751_v8 = vadd.f32 %v1750_v48, %v1749_v30  ;;  %v1752_v11 = vpop.f32.mrb[14].mxu1 }
 0x276   : > { %v1753_v31 = vpop.f32.mrb[15].mxu1 }
 0x277   : > { %v1358_v5 = vadd.f32 %v1751_v8, %v2984_v21  ;;  %v1754_v57 = vadd.f32 %v1753_v31, %v1752_v11 }
 0x279   : > { %1466 = vst [vmem:[%s2989_s13 + $0x30] sm:$0xff] %v1358_v5  ;;  %v1361_v61 = vadd.f32 %v1754_v57, %v2984_v21 }
 0x27b   : > { %1467 = vst [vmem:[%s2989_s13 + $0x38] sm:$0xff] %v1361_v61  ;;  %v1755_v46 = vpop.f32.mrb[16].mxu1 }
 0x27c   : > { %v1756_v53 = vpop.f32.mrb[17].mxu1 }
 0x27d   : > { %v1757_v29 = vadd.f32 %v1756_v53, %v1755_v46  ;;  %v1758_v28 = vpop.f32.mrb[18].mxu1 }
 0x27e   : > { %v1759_v56 = vpop.f32.mrb[19].mxu1 }
 0x27f   : > { %v1366_v58 = vadd.f32 %v1757_v29, %v2984_v21  ;;  %v1760_v3 = vadd.f32 %v1759_v56, %v1758_v28 }
 0x281   : > { %1468 = vst [vmem:[%s2989_s13 + $0x40] sm:$0xff] %v1366_v58  ;;  %v1369_v59 = vadd.f32 %v1760_v3, %v2984_v21 }
 0x283   : > { %1469 = vst [vmem:[%s2989_s13 + $0x48] sm:$0xff] %v1369_v59  ;;  %v1761_v60 = vpop.f32.mrb[20].mxu1 }
 0x284   : > { %v1762_v24 = vpop.f32.mrb[21].mxu1 }
 0x285   : > { %v1763_v2 = vadd.f32 %v1762_v24, %v1761_v60  ;;  %v1764_v33 = vpop.f32.mrb[22].mxu1 }
 0x286   : > { %v1765_v51 = vpop.f32.mrb[23].mxu1 }
 0x287   : > { %v1374_v41 = vadd.f32 %v1763_v2, %v2984_v21  ;;  %v1766_v44 = vadd.f32 %v1765_v51, %v1764_v33 }
 0x289   : > { %1470 = vst [vmem:[%s2989_s13 + $0x50] sm:$0xff] %v1374_v41  ;;  %v1377_v55 = vadd.f32 %v1766_v44, %v2984_v21 }
 0x28b   : > { %1471 = vst [vmem:[%s2989_s13 + $0x58] sm:$0xff] %v1377_v55  ;;  %v1767_v4 = vpop.f32.mrb[24].mxu1 }
 0x28c   : > { %v1768_v7 = vpop.f32.mrb[25].mxu1 }
 0x28d   : > { %v1769_v9 = vadd.f32 %v1768_v7, %v1767_v4  ;;  %v1770_v1 = vpop.f32.mrb[26].mxu1 }
 0x28e   : > { %v1771_v10 = vpop.f32.mrb[27].mxu1 }
 0x28f   : > { %v1382_v36 = vadd.f32 %v1769_v9, %v2984_v21  ;;  %v1772_v13 = vadd.f32 %v1771_v10, %v1770_v1 }
 0x291   : > { %1472 = vst [vmem:[%s2989_s13 + $0x60] sm:$0xff] %v1382_v36  ;;  %v1385_v14 = vadd.f32 %v1772_v13, %v2984_v21 }
 0x293   : > { %1473 = vst [vmem:[%s2989_s13 + $0x68] sm:$0xff] %v1385_v14  ;;  %v1773_v50 = vpop.f32.mrb[28].mxu1 }
 0x294   : > { %v1774_v38 = vpop.f32.mrb[29].mxu1 }
 0x295   : > { %v1775_v17 = vadd.f32 %v1774_v38, %v1773_v50  ;;  %v1776_v20 = vpop.f32.mrb[30].mxu1 }
 0x296   : > { %v1777_v45 = vpop.f32.mrb[31].mxu1 }
 0x297   : > { %v1390_v23 = vadd.f32 %v1775_v17, %v2984_v21  ;;  %v1778_v49 = vadd.f32 %v1777_v45, %v1776_v20 }
 0x299   : > { %1474 = vst [vmem:[%s2989_s13 + $0x70] sm:$0xff] %v1390_v23  ;;  %v1393_v19 = vadd.f32 %v1778_v49, %v2984_v21 }
 0x29b   : > { %1475 = vst [vmem:[%s2989_s13 + $0x78] sm:$0xff] %v1393_v19 }
 0x29c   : > { %v1779_v22 = vpop.f32.mrb[32].mxu1 }
 0x29d   : > { %v1780_v43 = vpop.f32.mrb[33].mxu1 }
 0x29e   : > { %v1781_v18 = vadd.f32 %v1780_v43, %v1779_v22  ;;  %v1782_v52 = vpop.f32.mrb[34].mxu1 }
 0x29f   : > { %v1783_v37 = vpop.f32.mrb[35].mxu1 }
 0x2a0   : > { %v1398_v42 = vadd.f32 %v1781_v18, %v2984_v21  ;;  %v1784_v63 = vadd.f32 %v1783_v37, %v1782_v52 }
 0x2a2   : > { %1476 = vst [vmem:[%s2989_s13 + $0x80] sm:$0xff] %v1398_v42  ;;  %v1401_v16 = vadd.f32 %v1784_v63, %v2984_v21 }
 0x2a4   : > { %1477 = vst [vmem:[%s2989_s13 + $0x88] sm:$0xff] %v1401_v16  ;;  %v1785_v26 = vpop.f32.mrb[36].mxu1 }
 0x2a5   : > { %v1786_v25 = vpop.f32.mrb[37].mxu1 }
 0x2a6   : > { %v1787_v27 = vadd.f32 %v1786_v25, %v1785_v26  ;;  %v1788_v54 = vpop.f32.mrb[38].mxu1 }
 0x2a7   : > { %v1789_v15 = vpop.f32.mrb[39].mxu1 }
 0x2a8   : > { %v1406_v32 = vadd.f32 %v1787_v27, %v2984_v21  ;;  %v1790_v0 = vadd.f32 %v1789_v15, %v1788_v54 }
 0x2aa   : > { %1478 = vst [vmem:[%s2989_s13 + $0x90] sm:$0xff] %v1406_v32  ;;  %v1409_v35 = vadd.f32 %v1790_v0, %v2984_v21 }
 0x2ac   : > { %1479 = vst [vmem:[%s2989_s13 + $0x98] sm:$0xff] %v1409_v35  ;;  %v1791_v39 = vpop.f32.mrb[40].mxu1 }
 0x2ad   : > { %v1792_v62 = vpop.f32.mrb[41].mxu1 }
 0x2ae   : > { %v1793_v34 = vadd.f32 %v1792_v62, %v1791_v39  ;;  %v1794_v40 = vpop.f32.mrb[42].mxu1 }
 0x2af   : > { %v1795_v6 = vpop.f32.mrb[43].mxu1 }
 0x2b0   : > { %v1414_v47 = vadd.f32 %v1793_v34, %v2984_v21  ;;  %v1796_v12 = vadd.f32 %v1795_v6, %v1794_v40 }
 0x2b2   : > { %1480 = vst [vmem:[%s2989_s13 + $0xa0] sm:$0xff] %v1414_v47  ;;  %v1417_v30 = vadd.f32 %v1796_v12, %v2984_v21 }
 0x2b4   : > { %1481 = vst [vmem:[%s2989_s13 + $0xa8] sm:$0xff] %v1417_v30 }
 0x2b5   : > { %v1797_v48 = vpop.f32.mrb[44].mxu1 }
 0x2b6   : > { %v1798_v8 = vpop.f32.mrb[45].mxu1 }
 0x2b7   : > { %v1799_v11 = vadd.f32 %v1798_v8, %v1797_v48  ;;  %v1800_v31 = vpop.f32.mrb[46].mxu1 }
 0x2b8   : > { %v1801_v5 = vpop.f32.mrb[47].mxu1 }
 0x2b9   : > { %v1422_v57 = vadd.f32 %v1799_v11, %v2984_v21  ;;  %v1802_v61 = vadd.f32 %v1801_v5, %v1800_v31 }
 0x2bb   : > { %1482 = vst [vmem:[%s2989_s13 + $0xb0] sm:$0xff] %v1422_v57  ;;  %v1425_v46 = vadd.f32 %v1802_v61, %v2984_v21 }
 0x2bd   : > { %1483 = vst [vmem:[%s2989_s13 + $0xb8] sm:$0xff] %v1425_v46  ;;  %v1803_v53 = vpop.f32.mrb[48].mxu1 }
 0x2be   : > { %v1804_v29 = vpop.f32.mrb[49].mxu1 }
 0x2bf   : > { %v1805_v28 = vadd.f32 %v1804_v29, %v1803_v53  ;;  %v1806_v56 = vpop.f32.mrb[50].mxu1 }
 0x2c0   : > { %v1807_v58 = vpop.f32.mrb[51].mxu1 }
 0x2c1   : > { %v1430_v3 = vadd.f32 %v1805_v28, %v2984_v21  ;;  %v1808_v59 = vadd.f32 %v1807_v58, %v1806_v56 }
 0x2c3   : > { %1484 = vst [vmem:[%s2989_s13 + $0xc0] sm:$0xff] %v1430_v3  ;;  %v1433_v60 = vadd.f32 %v1808_v59, %v2984_v21 }
 0x2c5   : > { %1485 = vst [vmem:[%s2989_s13 + $0xc8] sm:$0xff] %v1433_v60  ;;  %v1809_v24 = vpop.f32.mrb[52].mxu1 }
 0x2c6   : > { %v1810_v2 = vpop.f32.mrb[53].mxu1 }
 0x2c7   : > { %v1811_v33 = vadd.f32 %v1810_v2, %v1809_v24  ;;  %v1812_v51 = vpop.f32.mrb[54].mxu1 }
 0x2c8   : > { %v1813_v41 = vpop.f32.mrb[55].mxu1 }
 0x2c9   : > { %v1438_v44 = vadd.f32 %v1811_v33, %v2984_v21  ;;  %v1814_v55 = vadd.f32 %v1813_v41, %v1812_v51 }
 0x2cb   : > { %1486 = vst [vmem:[%s2989_s13 + $0xd0] sm:$0xff] %v1438_v44  ;;  %v1441_v4 = vadd.f32 %v1814_v55, %v2984_v21 }
 0x2cd   : > { %1487 = vst [vmem:[%s2989_s13 + $0xd8] sm:$0xff] %v1441_v4 }
 0x2ce   : > { %v1815_v7 = vpop.f32.mrb[56].mxu1 }
 0x2cf   : > { %v1816_v9 = vpop.f32.mrb[57].mxu1 }
 0x2d0   : > { %v1817_v1 = vadd.f32 %v1816_v9, %v1815_v7  ;;  %v1818_v10 = vpop.f32.mrb[58].mxu1 }
 0x2d1   : > { %v1819_v36 = vpop.f32.mrb[59].mxu1 }
 0x2d2   : > { %v1446_v13 = vadd.f32 %v1817_v1, %v2984_v21  ;;  %v1820_v14 = vadd.f32 %v1819_v36, %v1818_v10 }
 0x2d4   : > { %1488 = vst [vmem:[%s2989_s13 + $0xe0] sm:$0xff] %v1446_v13  ;;  %v1449_v50 = vadd.f32 %v1820_v14, %v2984_v21 }
 0x2d6   : > { %1489 = vst [vmem:[%s2989_s13 + $0xe8] sm:$0xff] %v1449_v50  ;;  %v1821_v38 = vpop.f32.mrb[60].mxu1 }
 0x2d7   : > { %v1822_v17 = vpop.f32.mrb[61].mxu1 }
 0x2d8   : > { %v1823_v20 = vadd.f32 %v1822_v17, %v1821_v38  ;;  %v1824_v45 = vpop.f32.mrb[62].mxu1 }
 0x2d9   : > { %v1825_v23 = vpop.f32.mrb[63].mxu1 }
 0x2da   : > { %v1454_v49 = vadd.f32 %v1823_v20, %v2984_v21  ;;  %v1826_v19 = vadd.f32 %v1825_v23, %v1824_v45 }
 0x2dc   : > { %1490 = vst [vmem:[%s2989_s13 + $0xf0] sm:$0xff] %v1454_v49  ;;  %v1457_v22 = vadd.f32 %v1826_v19, %v2984_v21 }
 0x2de   : > { %1491 = vst [vmem:[%s2989_s13 + $0xf8] sm:$0xff] %v1457_v22 }
 0x2df   : > { %2296 = shalt.err (!%p2293_p1)
}
 0x2e0   : > { %s2297_s25 = scalar_lea.hbm %s3056_s23, 4096  ;;  %s2301_s16 = scalar_lea.hbm %s3112_s7, 8192 }
 0x2e1   : > { %p2298_p13 = scmp.ne.s32.totalorder %s3056_s23, %s2297_s25  ;;  %p2302_p4 = scmp.lt.u32.totalorder %s3056_s23, %s3112_s7 }
 0x2e2   : > { %p2303_p7 = scmp.lt.u32.totalorder %s2301_s16, %s2297_s25  ;;  %p2305_p11 = scmp.lt.u32.totalorder %s2297_s25, %s3056_s23 }
 0x2e3   : > { %p2299_p6 = pnand %p2298_p13, %p3126_p0 }
 0x2e4   : > { %p2304_p8 = por %p2303_p7, %p2302_p4 }
 0x2e5   : > { %p2300_p10 = pneg %p2299_p6 }
 0x2e6   : > { %p2306_p2 = por %p2305_p11, %p2304_p8 }
 0x2e8   : > { %p2307_p3 = pnand %p2306_p2, %p2300_p10 }
 0x2ea   : > { %2310 = shalt.err (!%p2307_p3)
}
 0x2eb   : > { %s2364_s12 = smov 128   ;;  %s2365_s21 = smov 8  }
 0x2ec   : > { %1837 = dma.vmem_to_hbm [thread:$0]  (%p3126_p0), %s3058_s15, 4096, %s3056_s23, %s1493_s0, %s2364_s12, %s2364_s12, %s2365_s21  }
 0x2ed PF: > { %s1521_s11 = sand.u32 1, %s2341_s26   ;;  %p3127_p5 = scmp.ne.s32.totalorder %s3117_s9, 0 }
 0x2ee   : > { %p3128_p9 = scmp.ge.s32.totalorder %s2353_s29, 2  ;;  %s1522_s8 = scalar_lea.sflag [#allocation5], %s1521_s11 }
 0x2f0   : > { %p1851_p12 = pnand %p3128_p9, %p3127_p5 }
 0x2f2   : > { %2336 = dma.done.wait (!%p1851_p12), %s1522_s8, 4096  }
 0x2f3   : > { %2338 = vsyncadd (!%p1851_p12), %s1522_s8, 4294963200  ;;  %p22_p1 = scmp.ge.s32.totalorder %s2522_s14, 4   ;;  %s3129_s26 = smov %s2345_s27 }
 0x2f4   : > { %s3130_s27 = smov %s2349_s28  ;;  %s3131_s28 = smov %s2531_s18 }
 0x2f5   : > { %s3132_s29 = smov %s2522_s14  ;;  %24 = sbr.rel (!%p22_p1) target bundleno = 8 (0x8), region = 101 }
 0x2fc   :  { %1527 = vsyncpa [#allocation4], 1 }
 0x2fd   :  { %1529 = vsyncpa [#allocation4 + $0x1], 1 }
 0x2fe   :  { %1530 = vsyncpa [#allocation7], 1 }
 0x2ff   :  { %1531 = vsyncpa [#allocation5], 1 }
 0x300   :  { %1533 = vsyncpa [#allocation5 + $0x1], 1 }

</bundles_post_ra>
